<compile_context>
chip_gen: v7x
topology: tpu7x:2x2x1
jax: 0.10.0
libtpu: 0.0.40
codegen_flags: <defaults>
</compile_context>

<pallas_src>
import jax
import jax.numpy as jnp
from jax.experimental import pallas as pl
from jax.experimental.pallas import tpu as pltpu

LANE = 128


def _round_up(n, m):
    return (n + m - 1) // m * m


def _mlp_kernel(x_ref,
                w1, b1, w2, b2, w3, b3, w4, b4, w5, b5,
                o_ref):
    """Whole 5-layer MLP hot path: 5 bf16 MXU matmuls (f32 acc) + f32 relu/tanh."""
    # x tile arrives as bf16.
    h = jnp.dot(x_ref[...], w1[...], preferred_element_type=jnp.float32) + b1[...]
    h = jnp.maximum(h, 0.0)

    h = jnp.dot(h.astype(jnp.bfloat16), w2[...],
                preferred_element_type=jnp.float32) + b2[...]
    h = jnp.maximum(h, 0.0)

    h = jnp.dot(h.astype(jnp.bfloat16), w3[...],
                preferred_element_type=jnp.float32) + b3[...]
    h = jnp.maximum(h, 0.0)

    h = jnp.dot(h.astype(jnp.bfloat16), w4[...],
                preferred_element_type=jnp.float32) + b4[...]
    h = jnp.maximum(h, 0.0)

    out = jnp.dot(h.astype(jnp.bfloat16), w5[...],
                  preferred_element_type=jnp.float32) + b5[...]
    o_ref[...] = jnp.tanh(out)


def fs_network_forward(x, kparams, *, out_joints=1, block_batch=256):
    """x: [B, D] float32 (D = window*in_joints*2).
    kparams: padded kernel params from prepare_kernel_params().
    Returns [B, out_joints] float32."""
    assert block_batch % 8 == 0, "block_batch must be a multiple of 8 (use 128/256/512)"
    B, D = x.shape
    d_in = kparams["w1"].shape[0]    # feature dim padded to a multiple of 128
    d_out = kparams["w5"].shape[1]   # output dim padded to a multiple of 128
    assert D <= d_in and out_joints <= d_out

    # Pad the batch remainder and the feature dim with zeros; downcast the
    # activations to bf16 so the x DMA is half-width and MXU-ready.
    b_pad = _round_up(max(B, 1), block_batch)
    x_p = jnp.pad(x, ((0, b_pad - B), (0, d_in - D))).astype(jnp.bfloat16)

    grid = (b_pad // block_batch,)

    def resident(arr):
        # Constant block index: the weight/bias tile never changes, so it stays
        # resident in VMEM across grid iterations (params total < 0.5 MB bf16,
        # so default double-buffering cost is negligible).
        return pl.BlockSpec(arr.shape, lambda i: (0, 0))

    param_order = ("w1", "b1", "w2", "b2", "w3", "b3", "w4", "b4", "w5", "b5")
    in_specs = [pl.BlockSpec((block_batch, d_in), lambda i: (i, 0))]
    in_specs += [resident(kparams[k]) for k in param_order]
    out_specs = pl.BlockSpec((block_batch, d_out), lambda i: (i, 0))

    out = pl.pallas_call(
        _mlp_kernel,
        out_shape=jax.ShapeDtypeStruct((b_pad, d_out), jnp.float32),
        grid=grid,
        in_specs=in_specs,
        out_specs=out_specs,
        compiler_params=pltpu.CompilerParams(
            dimension_semantics=("parallel",),
            vmem_limit_bytes=32 * 1024 * 1024),
    )(x_p, *(kparams[k] for k in param_order))

    # Strip batch padding and the lane-padding of the final layer.
    return out[:B, :out_joints]


def init_fs_network_params(key, window, in_joints=6, out_joints=1):
    """f32, unpadded parameters matching PyTorch nn.Linear default init:
    U(-1/sqrt(fan_in), 1/sqrt(fan_in)) for weight and bias.
    Weights stored as [in, out] so forward is x @ W + b."""
    dims = [window * in_joints * 2, 256, 256, 256, 128, out_joints]
    params = {}
    for idx in range(5):
        fan_in, fan_out = dims[idx], dims[idx + 1]
        key, kw, kb = jax.random.split(key, 3)
        bound = 1.0 / (fan_in ** 0.5)
        params[f"w{idx + 1}"] = jax.random.uniform(
            kw, (fan_in, fan_out), jnp.float32, -bound, bound)
        params[f"b{idx + 1}"] = jax.random.uniform(
            kb, (1, fan_out), jnp.float32, -bound, bound)
    return params


def prepare_kernel_params(params, lane=LANE):
    """Zero-pad every layer's in/out dims up to multiples of 128 and cast the
    weights (MXU operands) to bf16.  Biases stay f32 (added to the f32 acc)."""
    kp = {}
    for i in range(1, 6):
        w = params[f"w{i}"].astype(jnp.float32)
        b = params[f"b{i}"].astype(jnp.float32)
        din = _round_up(w.shape[0], lane)
        dout = _round_up(w.shape[1], lane)
        w = jnp.pad(w, ((0, din - w.shape[0]), (0, dout - w.shape[1])))
        b = jnp.pad(b, ((0, 0), (0, dout - b.shape[1])))
        kp[f"w{i}"] = w.astype(jnp.bfloat16)
        kp[f"b{i}"] = b
    return kp


def fs_network_ref(x, params):
    """Pure-JAX f32 reference (matches the PyTorch forward)."""
    h = x
    for i in range(1, 5):
        h = jnp.maximum(h @ params[f"w{i}"] + params[f"b{i}"], 0.0)
    return jnp.tanh(h @ params["w5"] + params["b5"])


if __name__ == "__main__":
    window = 8
    in_joints = 6
    out_joints = 1
    feat = window * in_joints * 2       # 96
    batch = 500                         # deliberately NOT a multiple of the tile

    key = jax.random.PRNGKey(0)
    key, kx = jax.random.split(key)
    x = jax.random.normal(kx, (batch, feat), jnp.float32)

    params = init_fs_network_params(jax.random.PRNGKey(0), window,
                                    in_joints, out_joints)
    kparams = prepare_kernel_params(params)

    out = fs_network_forward(x, kparams, out_joints=out_joints, block_batch=256)
    out = jax.block_until_ready(out)

    ref = fs_network_ref(x, params)
    assert out.shape == (batch, out_joints)
    max_err = float(jnp.max(jnp.abs(out - ref)))
    # bf16 matmul operands with f32 accumulation -> ~1e-2-level deviation.
    assert jnp.allclose(out, ref, atol=5e-2, rtol=5e-2), \
        f"mismatch vs reference (max abs err {max_err})"

    print("KERNEL_OK")
</pallas_src>

<mosaic_0001>
module attributes {stable_mosaic.version = 11 : i64} {
  func.func @_mlp_kernel(%arg0: i32, %arg1: memref<256x128xbf16, #tpu.memory_space<vmem>>, %arg2: memref<128x256xbf16, #tpu.memory_space<vmem>>, %arg3: memref<1x256xf32, #tpu.memory_space<vmem>>, %arg4: memref<256x256xbf16, #tpu.memory_space<vmem>>, %arg5: memref<1x256xf32, #tpu.memory_space<vmem>>, %arg6: memref<256x256xbf16, #tpu.memory_space<vmem>>, %arg7: memref<1x256xf32, #tpu.memory_space<vmem>>, %arg8: memref<256x128xbf16, #tpu.memory_space<vmem>>, %arg9: memref<1x128xf32, #tpu.memory_space<vmem>>, %arg10: memref<128x128xbf16, #tpu.memory_space<vmem>>, %arg11: memref<1x128xf32, #tpu.memory_space<vmem>>, %arg12: memref<256x128xf32, #tpu.memory_space<vmem>>) attributes {dimension_semantics = [#tpu.dimension_semantics<parallel>], iteration_bounds = array<i64: 2>, scalar_prefetch = 0 : i64, scratch_operands = 0 : i64, tpu.core_type = #tpu.core_type<tc>, window_params = [{transform_indices = @transform_0, window_bounds = array<i64: 256, 128>}, {pipeline_mode = #tpu.pipeline_mode<synchronous>, transform_indices = @transform_1, window_bounds = array<i64: 128, 256>}, {pipeline_mode = #tpu.pipeline_mode<synchronous>, transform_indices = @transform_2, window_bounds = array<i64: 1, 256>}, {pipeline_mode = #tpu.pipeline_mode<synchronous>, transform_indices = @transform_3, window_bounds = array<i64: 256, 256>}, {pipeline_mode = #tpu.pipeline_mode<synchronous>, transform_indices = @transform_4, window_bounds = array<i64: 1, 256>}, {pipeline_mode = #tpu.pipeline_mode<synchronous>, transform_indices = @transform_5, window_bounds = array<i64: 256, 256>}, {pipeline_mode = #tpu.pipeline_mode<synchronous>, transform_indices = @transform_6, window_bounds = array<i64: 1, 256>}, {pipeline_mode = #tpu.pipeline_mode<synchronous>, transform_indices = @transform_7, window_bounds = array<i64: 256, 128>}, {pipeline_mode = #tpu.pipeline_mode<synchronous>, transform_indices = @transform_8, window_bounds = array<i64: 1, 128>}, {pipeline_mode = #tpu.pipeline_mode<synchronous>, transform_indices = @transform_9, window_bounds = array<i64: 128, 128>}, {pipeline_mode = #tpu.pipeline_mode<synchronous>, transform_indices = @transform_10, window_bounds = array<i64: 1, 128>}, {transform_indices = @transform_11, window_bounds = array<i64: 256, 128>}]} {
    %c0 = arith.constant 0 : index
    %c0_0 = arith.constant 0 : index
    %0 = vector.load %arg1[%c0, %c0_0] : memref<256x128xbf16, #tpu.memory_space<vmem>>, vector<256x128xbf16>
    %c0_1 = arith.constant 0 : index
    %c0_2 = arith.constant 0 : index
    %1 = vector.load %arg2[%c0_1, %c0_2] : memref<128x256xbf16, #tpu.memory_space<vmem>>, vector<128x256xbf16>
    %cst = arith.constant dense<0.000000e+00> : vector<256x256xf32>
    %2 = tpu.matmul %0, %1, %cst {dimension_numbers = #tpu.dot_dimension_numbers<[1], [0], [0], [1], [0, 0, 1, 1], [], []>} : vector<256x128xbf16>, vector<128x256xbf16>, vector<256x256xf32> -> vector<256x256xf32>
    %c0_3 = arith.constant 0 : index
    %c0_4 = arith.constant 0 : index
    %3 = vector.load %arg3[%c0_3, %c0_4] : memref<1x256xf32, #tpu.memory_space<vmem>>, vector<1x256xf32>
    %4 = vector.broadcast %3 : vector<1x256xf32> to vector<256x256xf32>
    %5 = arith.addf %2, %4 : vector<256x256xf32>
    %cst_5 = arith.constant 0.000000e+00 : f32
    %6 = vector.broadcast %cst_5 : f32 to vector<256x256xf32>
    %7 = arith.maximumf %5, %6 : vector<256x256xf32>
    %8 = arith.truncf %7 : vector<256x256xf32> to vector<256x256xbf16>
    %c0_6 = arith.constant 0 : index
    %c0_7 = arith.constant 0 : index
    %9 = vector.load %arg4[%c0_6, %c0_7] : memref<256x256xbf16, #tpu.memory_space<vmem>>, vector<256x256xbf16>
    %cst_8 = arith.constant dense<0.000000e+00> : vector<256x256xf32>
    %10 = tpu.matmul %8, %9, %cst_8 {dimension_numbers = #tpu.dot_dimension_numbers<[1], [0], [0], [1], [0, 0, 1, 1], [], []>} : vector<256x256xbf16>, vector<256x256xbf16>, vector<256x256xf32> -> vector<256x256xf32>
    %c0_9 = arith.constant 0 : index
    %c0_10 = arith.constant 0 : index
    %11 = vector.load %arg5[%c0_9, %c0_10] : memref<1x256xf32, #tpu.memory_space<vmem>>, vector<1x256xf32>
    %12 = vector.broadcast %11 : vector<1x256xf32> to vector<256x256xf32>
    %13 = arith.addf %10, %12 : vector<256x256xf32>
    %cst_11 = arith.constant 0.000000e+00 : f32
    %14 = vector.broadcast %cst_11 : f32 to vector<256x256xf32>
    %15 = arith.maximumf %13, %14 : vector<256x256xf32>
    %16 = arith.truncf %15 : vector<256x256xf32> to vector<256x256xbf16>
    %c0_12 = arith.constant 0 : index
    %c0_13 = arith.constant 0 : index
    %17 = vector.load %arg6[%c0_12, %c0_13] : memref<256x256xbf16, #tpu.memory_space<vmem>>, vector<256x256xbf16>
    %cst_14 = arith.constant dense<0.000000e+00> : vector<256x256xf32>
    %18 = tpu.matmul %16, %17, %cst_14 {dimension_numbers = #tpu.dot_dimension_numbers<[1], [0], [0], [1], [0, 0, 1, 1], [], []>} : vector<256x256xbf16>, vector<256x256xbf16>, vector<256x256xf32> -> vector<256x256xf32>
    %c0_15 = arith.constant 0 : index
    %c0_16 = arith.constant 0 : index
    %19 = vector.load %arg7[%c0_15, %c0_16] : memref<1x256xf32, #tpu.memory_space<vmem>>, vector<1x256xf32>
    %20 = vector.broadcast %19 : vector<1x256xf32> to vector<256x256xf32>
    %21 = arith.addf %18, %20 : vector<256x256xf32>
    %cst_17 = arith.constant 0.000000e+00 : f32
    %22 = vector.broadcast %cst_17 : f32 to vector<256x256xf32>
    %23 = arith.maximumf %21, %22 : vector<256x256xf32>
    %24 = arith.truncf %23 : vector<256x256xf32> to vector<256x256xbf16>
    %c0_18 = arith.constant 0 : index
    %c0_19 = arith.constant 0 : index
    %25 = vector.load %arg8[%c0_18, %c0_19] : memref<256x128xbf16, #tpu.memory_space<vmem>>, vector<256x128xbf16>
    %cst_20 = arith.constant dense<0.000000e+00> : vector<256x128xf32>
    %26 = tpu.matmul %24, %25, %cst_20 {dimension_numbers = #tpu.dot_dimension_numbers<[1], [0], [0], [1], [0, 0, 1, 1], [], []>} : vector<256x256xbf16>, vector<256x128xbf16>, vector<256x128xf32> -> vector<256x128xf32>
    %c0_21 = arith.constant 0 : index
    %c0_22 = arith.constant 0 : index
    %27 = vector.load %arg9[%c0_21, %c0_22] : memref<1x128xf32, #tpu.memory_space<vmem>>, vector<1x128xf32>
    %28 = vector.broadcast %27 : vector<1x128xf32> to vector<256x128xf32>
    %29 = arith.addf %26, %28 : vector<256x128xf32>
    %cst_23 = arith.constant 0.000000e+00 : f32
    %30 = vector.broadcast %cst_23 : f32 to vector<256x128xf32>
    %31 = arith.maximumf %29, %30 : vector<256x128xf32>
    %32 = arith.truncf %31 : vector<256x128xf32> to vector<256x128xbf16>
    %c0_24 = arith.constant 0 : index
    %c0_25 = arith.constant 0 : index
    %33 = vector.load %arg10[%c0_24, %c0_25] : memref<128x128xbf16, #tpu.memory_space<vmem>>, vector<128x128xbf16>
    %cst_26 = arith.constant dense<0.000000e+00> : vector<256x128xf32>
    %34 = tpu.matmul %32, %33, %cst_26 {dimension_numbers = #tpu.dot_dimension_numbers<[1], [0], [0], [1], [0, 0, 1, 1], [], []>} : vector<256x128xbf16>, vector<128x128xbf16>, vector<256x128xf32> -> vector<256x128xf32>
    %c0_27 = arith.constant 0 : index
    %c0_28 = arith.constant 0 : index
    %35 = vector.load %arg11[%c0_27, %c0_28] : memref<1x128xf32, #tpu.memory_space<vmem>>, vector<1x128xf32>
    %36 = vector.broadcast %35 : vector<1x128xf32> to vector<256x128xf32>
    %37 = arith.addf %34, %36 : vector<256x128xf32>
    %38 = math.tanh %37 : vector<256x128xf32>
    %c0_29 = arith.constant 0 : index
    %c0_30 = arith.constant 0 : index
    %39 = vector.load %arg12[%c0_29, %c0_30] : memref<256x128xf32, #tpu.memory_space<vmem>>, vector<256x128xf32>
    tpu.vector_store %arg12[%c0_29, %c0_30], %38 {strides = array<i32>} : memref<256x128xf32, #tpu.memory_space<vmem>>, vector<256x128xf32>,
    return
  }
  func.func @transform_0(%arg0: i32) -> (i32, i32) {
    %c0_i32 = arith.constant 0 : i32
    %c0_i32_0 = arith.constant 0 : i32
    return %arg0, %c0_i32 : i32, i32
  }
  func.func @transform_1(%arg0: i32) -> (i32, i32) {
    %c0_i32 = arith.constant 0 : i32
    %c0_i32_0 = arith.constant 0 : i32
    %c0_i32_1 = arith.constant 0 : i32
    return %c0_i32, %c0_i32_0 : i32, i32
  }
  func.func @transform_2(%arg0: i32) -> (i32, i32) {
    %c0_i32 = arith.constant 0 : i32
    %c0_i32_0 = arith.constant 0 : i32
    %c0_i32_1 = arith.constant 0 : i32
    return %c0_i32, %c0_i32_0 : i32, i32
  }
  func.func @transform_3(%arg0: i32) -> (i32, i32) {
    %c0_i32 = arith.constant 0 : i32
    %c0_i32_0 = arith.constant 0 : i32
    %c0_i32_1 = arith.constant 0 : i32
    return %c0_i32, %c0_i32_0 : i32, i32
  }
  func.func @transform_4(%arg0: i32) -> (i32, i32) {
    %c0_i32 = arith.constant 0 : i32
    %c0_i32_0 = arith.constant 0 : i32
    %c0_i32_1 = arith.constant 0 : i32
    return %c0_i32, %c0_i32_0 : i32, i32
  }
  func.func @transform_5(%arg0: i32) -> (i32, i32) {
    %c0_i32 = arith.constant 0 : i32
    %c0_i32_0 = arith.constant 0 : i32
    %c0_i32_1 = arith.constant 0 : i32
    return %c0_i32, %c0_i32_0 : i32, i32
  }
  func.func @transform_6(%arg0: i32) -> (i32, i32) {
    %c0_i32 = arith.constant 0 : i32
    %c0_i32_0 = arith.constant 0 : i32
    %c0_i32_1 = arith.constant 0 : i32
    return %c0_i32, %c0_i32_0 : i32, i32
  }
  func.func @transform_7(%arg0: i32) -> (i32, i32) {
    %c0_i32 = arith.constant 0 : i32
    %c0_i32_0 = arith.constant 0 : i32
    %c0_i32_1 = arith.constant 0 : i32
    return %c0_i32, %c0_i32_0 : i32, i32
  }
  func.func @transform_8(%arg0: i32) -> (i32, i32) {
    %c0_i32 = arith.constant 0 : i32
    %c0_i32_0 = arith.constant 0 : i32
    %c0_i32_1 = arith.constant 0 : i32
    return %c0_i32, %c0_i32_0 : i32, i32
  }
  func.func @transform_9(%arg0: i32) -> (i32, i32) {
    %c0_i32 = arith.constant 0 : i32
    %c0_i32_0 = arith.constant 0 : i32
    %c0_i32_1 = arith.constant 0 : i32
    return %c0_i32, %c0_i32_0 : i32, i32
  }
  func.func @transform_10(%arg0: i32) -> (i32, i32) {
    %c0_i32 = arith.constant 0 : i32
    %c0_i32_0 = arith.constant 0 : i32
    %c0_i32_1 = arith.constant 0 : i32
    return %c0_i32, %c0_i32_0 : i32, i32
  }
  func.func @transform_11(%arg0: i32) -> (i32, i32) {
    %c0_i32 = arith.constant 0 : i32
    %c0_i32_0 = arith.constant 0 : i32
    return %arg0, %c0_i32 : i32, i32
  }
}

</mosaic_0001>

<bundles_post_ra>
// kernel: tpu_custom_call.1
= control target key start
LH: loop header
LB: loop body
LE: loop exit
PB: predicated region body
PF: predicated region fallthrough
CT: control target
= control target key end

     0   :  { %s4453_s0 = inlined_call_operand.hbm [shape: bf16[512,128], index: 0, kind: input, shape index: {}]   ;;  %s4454_s1 = inlined_call_operand.hbm [shape: bf16[128,256], index: 1, kind: input, shape index: {}]   ;;  %s4455_s2 = inlined_call_operand.vmem [shape: f32[1,256], index: 2, kind: input, shape index: {}]   ;;  %s4456_s3 = inlined_call_operand.hbm [shape: bf16[256,256], index: 3, kind: input, shape index: {}]   ;;  %s4457_s4 = inlined_call_operand.vmem [shape: f32[1,256], index: 4, kind: input, shape index: {}]   ;;  %s4458_s5 = inlined_call_operand.hbm [shape: bf16[256,256], index: 5, kind: input, shape index: {}]   ;;  %s4459_s6 = inlined_call_operand.vmem [shape: f32[1,256], index: 6, kind: input, shape index: {}]   ;;  %s4460_s7 = inlined_call_operand.hbm [shape: bf16[256,128], index: 7, kind: input, shape index: {}]   ;;  %s4461_s8 = inlined_call_operand.vmem [shape: f32[1,128], index: 8, kind: input, shape index: {}]   ;;  %s4462_s9 = inlined_call_operand.hbm [shape: bf16[128,128], index: 9, kind: input, shape index: {}]   ;;  %s4463_s10 = inlined_call_operand.vmem [shape: f32[1,128], index: 10, kind: input, shape index: {}]   ;;  %s4464_s11 = inlined_call_operand.hbm [shape: f32[512,128], index: 11, kind: output, shape index: {}]  }
   0x1   :  { %4471 = sst [smem:[#allocation19_spill]] %s4461_s8 }
   0x2   :  { %4472 = sst [smem:[#allocation20_spill]] %s4463_s10 }
   0x3   :  { %4473 = sst [smem:[#allocation21_spill]] %s4464_s11 }
   0x4   :  { %16 = vsyncpa [#allocation3], 0 }
   0x5   :  { %18 = vsyncpa [#allocation3 + $0x1], 0 }
   0x6   :  { %19 = vsyncpa [#allocation6], 0 }
   0x7   :  { %20 = vsyncpa [#allocation9], 0 }
   0x8   :  { %21 = vsyncpa [#allocation12], 0 }
   0x9   :  { %22 = vsyncpa [#allocation4], 0 }
   0xa   :  { %24 = vsyncpa [#allocation4 + $0x1], 0  ;;  %s3767_s17 = smov 0   ;;  %s3769_s18 = smov 0  }
   0xb   :  { %s3771_s19 = smov 0   ;;  %s3773_s20 = smov 0  }
   0xc LB: > { %s3693_s21 = smov [#allocation5]   ;;  %s3788_s23 = sadd.s32 4294967295, %s3691_s20   ;;  %s3691_s20 = sphi %s3773_s20, %s4500_s20   ;;  %s3687_s19 = sphi %s3771_s19, %s4499_s19   ;;  %s3683_s18 = sphi %s3769_s18, %s4498_s18   ;;  %s3679_s17 = sphi %s3767_s17, %s4497_s17  }
   0xd   : > { %s309_s22 = sshll.u32 %s3693_s21, 4  ;;  %p2768_p0 = scmp.ge.s32.totalorder %s3691_s20, 1  ;;  %s3793_s22 = int_to_ptr.vmem [resolvable:$true] %s309_s22 }
   0xe   : > { %p4466_p1 = scmp.eq.s32.totalorder %s3788_s23, 0  ;;  %p297_p2 = scmp.lt.s32.totalorder %s3691_s20, 3 }
   0xf   : > { %s3694_s25 = smov [#allocation8]   ;;  %s3695_s28 = smov [#allocation7]  }
  0x10   : > { %p3795_p3 = pnand %p2768_p0, %p297_p2  ;;  %s341_s26 = sshll.u32 %s3694_s25, 4  ;;  %s3808_s26 = int_to_ptr.vmem [resolvable:$true] %s341_s26 }
  0x11   : > { %s325_s29 = sshll.u32 %s3695_s28, 4  ;;  %s3443_s13 = scalar_lea.hbm %s4454_s1, 2048  ;;  %s3810_s29 = int_to_ptr.vmem [resolvable:$true] %s325_s29 }
  0x12   : > { %s4474_s24 = scalar_select %p3795_p3, 1, 0 }
  0x13   : > { %p3139_p5 = pneg %p3795_p3  ;;  %p3444_p7 = scmp.ne.s32.totalorder %s4454_s1, %s3443_s13 }
  0x14   : > { %p3450_p11 = scmp.lt.u32.totalorder %s3443_s13, %s4454_s1 }
  0x15   : > { %p3804_p6 = pnand %p3139_p5, %p4466_p1 }
  0x17   : > { %p3820_p8 = pneg %p3804_p6 }
  0x19   : > { %p3446_p9 = pnand %p3820_p8, %p3444_p7 }
  0x1b   : > { %p3447_p10 = pneg %p3446_p9 }
  0x1d   : > { %p3452_p12 = pnand %p3450_p11, %p3447_p10 }
  0x1f   : > { %3455 = shalt.err (!%p3452_p12)
}
  0x20   : > { %s3456_s28 = scalar_lea.vmem %s3793_s22, 2048  ;;  %p3464_p5 = scmp.lt.s32.totalorder %s3793_s22, %s3793_s22 }
  0x21   : > { %p3457_p13 = scmp.ne.s32.totalorder %s3793_s22, %s3456_s28  ;;  %p3465_p4 = scmp.lt.s32.totalorder %s3456_s28, %s3456_s28 }
  0x23   : > { %p3459_p0 = pnand %p3457_p13, %p3820_p8  ;;  %p3466_p7 = por %p3465_p4, %p3464_p5 }
  0x25   : > { %p3460_p2 = pneg %p3459_p0 }
  0x27   : > { %p3467_p9 = pnand %p3466_p7, %p3460_p2 }
  0x29   : > { %3470 = shalt.err (!%p3467_p9)
}
  0x2a   : > { %s3696_s30 = smov 128   ;;  %s3697_s12 = smov 8  }
  0x2b   : > { %3142 = dma.hbm_to_vmem [thread:$0]  (!%p3804_p6), %s4454_s1, 2048, %s3793_s22, [#allocation6], %s3696_s30, %s3696_s30, %s3697_s12  }
  0x2c   : > { %s3471_s25 = scalar_lea.hbm %s4458_s5, 4096 }
  0x2d   : > { %p3472_p4 = scmp.ne.s32.totalorder %s4458_s5, %s3471_s25  ;;  %p3478_p12 = scmp.lt.u32.totalorder %s3471_s25, %s4458_s5 }
  0x2f   : > { %p3474_p10 = pnand %p3472_p4, %p3820_p8 }
  0x31   : > { %p3475_p11 = pneg %p3474_p10 }
  0x33   : > { %p3480_p13 = pnand %p3478_p12, %p3475_p11 }
  0x35   : > { %3483 = shalt.err (!%p3480_p13)
}
  0x36   : > { %s3484_s22 = scalar_lea.vmem %s3808_s26, 4096  ;;  %p3492_p7 = scmp.lt.s32.totalorder %s3808_s26, %s3808_s26 }
  0x37   : > { %p3485_p0 = scmp.ne.s32.totalorder %s3808_s26, %s3484_s22  ;;  %p3493_p9 = scmp.lt.s32.totalorder %s3484_s22, %s3484_s22 }
  0x39   : > { %p3487_p2 = pnand %p3485_p0, %p3820_p8  ;;  %p3494_p4 = por %p3493_p9, %p3492_p7 }
  0x3b   : > { %p3488_p5 = pneg %p3487_p2 }
  0x3d   : > { %p3495_p10 = pnand %p3494_p4, %p3488_p5 }
  0x3f   : > { %3498 = shalt.err (!%p3495_p10)
}
  0x40   : > { %3148 = dma.hbm_to_vmem [thread:$0]  (!%p3804_p6), %s4458_s5, 4096, %s3808_s26, [#allocation9], %s3696_s30, %s3696_s30, %s3697_s12  }
  0x41   : > { %s3499_s14 = scalar_lea.hbm %s4456_s3, 4096 }
  0x42   : > { %p3500_p11 = scmp.ne.s32.totalorder %s4456_s3, %s3499_s14  ;;  %p3506_p0 = scmp.lt.u32.totalorder %s3499_s14, %s4456_s3 }
  0x44   : > { %p3502_p12 = pnand %p3500_p11, %p3820_p8 }
  0x46   : > { %p3503_p13 = pneg %p3502_p12 }
  0x48   : > { %p3508_p2 = pnand %p3506_p0, %p3503_p13 }
  0x4a   : > { %3511 = shalt.err (!%p3508_p2)
}
  0x4b   : > { %s3512_s26 = scalar_lea.vmem %s3810_s29, 4096  ;;  %p3520_p4 = scmp.lt.s32.totalorder %s3810_s29, %s3810_s29 }
  0x4c   : > { %p3513_p5 = scmp.ne.s32.totalorder %s3810_s29, %s3512_s26  ;;  %p3521_p10 = scmp.lt.s32.totalorder %s3512_s26, %s3512_s26 }
  0x4e   : > { %p3515_p7 = pnand %p3513_p5, %p3820_p8  ;;  %p3522_p11 = por %p3521_p10, %p3520_p4 }
  0x50   : > { %p3516_p9 = pneg %p3515_p7 }
  0x52   : > { %p3523_p12 = pnand %p3522_p11, %p3516_p9 }
  0x54   : > { %3526 = shalt.err (!%p3523_p12)
}
  0x55   : > { %3145 = dma.hbm_to_vmem [thread:$0]  (!%p3804_p6), %s4456_s3, 4096, %s3810_s29, [#allocation6], %s3696_s30, %s3696_s30, %s3697_s12  }
  0x56   : > { %s3698_s10 = smov [#allocation10]   ;;  %s3527_s15 = scalar_lea.hbm %s4460_s7, 2048 }
  0x57   : > { %s357_s11 = sshll.u32 %s3698_s10, 4  ;;  %p3528_p13 = scmp.ne.s32.totalorder %s4460_s7, %s3527_s15  ;;  %s358_s11 = int_to_ptr.vmem [resolvable:$true] %s357_s11 }
  0x58   : > { %p3534_p5 = scmp.lt.u32.totalorder %s3527_s15, %s4460_s7 }
  0x59   : > { %p3530_p0 = pnand %p3528_p13, %p3820_p8 }
  0x5b   : > { %p3531_p2 = pneg %p3530_p0 }
  0x5d   : > { %p3536_p7 = pnand %p3534_p5, %p3531_p2 }
  0x5f   : > { %3539 = shalt.err (!%p3536_p7)
}
  0x60   : > { %s3540_s29 = scalar_lea.vmem %s358_s11, 2048  ;;  %p3548_p11 = scmp.lt.s32.totalorder %s358_s11, %s358_s11 }
  0x61   : > { %p3541_p9 = scmp.ne.s32.totalorder %s358_s11, %s3540_s29  ;;  %p3549_p12 = scmp.lt.s32.totalorder %s3540_s29, %s3540_s29 }
  0x63   : > { %p3543_p4 = pnand %p3541_p9, %p3820_p8  ;;  %p3550_p1 = por %p3549_p12, %p3548_p11 }
  0x65   : > { %p3544_p10 = pneg %p3543_p4 }
  0x67   : > { %p3551_p3 = pnand %p3550_p1, %p3544_p10 }
  0x69   : > { %3554 = shalt.err (!%p3551_p3)
}
  0x6a   : > { %s4468_s30 = smov 64   ;;  %s4469_s12 = smov 4  }
  0x6b   : > { %3151 = dma.hbm_to_vmem [thread:$0]  (!%p3804_p6), %s4460_s7, 2048, %s358_s11, [#allocation9], %s4468_s30, %s4468_s30, %s4469_s12  }
  0x6c   : > { %s3701_s10 = smov [#allocation11]   ;;  %s3555_s21 = scalar_lea.hbm %s4462_s9, 1024 }
  0x6d   : > { %s373_s13 = sshll.u32 %s3701_s10, 4  ;;  %p3556_p1 = scmp.ne.s32.totalorder %s4462_s9, %s3555_s21  ;;  %s374_s13 = int_to_ptr.vmem [resolvable:$true] %s373_s13 }
  0x6e   : > { %p3562_p0 = scmp.lt.u32.totalorder %s3555_s21, %s4462_s9 }
  0x6f   : > { %p3558_p3 = pnand %p3556_p1, %p3820_p8 }
  0x71   : > { %p3559_p13 = pneg %p3558_p3 }
  0x73   : > { %p3564_p2 = pnand %p3562_p0, %p3559_p13 }
  0x75   : > { %3567 = shalt.err (!%p3564_p2)
}
  0x76   : > { %s3568_s11 = scalar_lea.vmem %s374_s13, 1024  ;;  %p3576_p4 = scmp.lt.s32.totalorder %s374_s13, %s374_s13 }
  0x77   : > { %p3569_p5 = scmp.ne.s32.totalorder %s374_s13, %s3568_s11  ;;  %p3577_p10 = scmp.lt.s32.totalorder %s3568_s11, %s3568_s11 }
  0x79   : > { %p3571_p7 = pnand %p3569_p5, %p3820_p8  ;;  %p3578_p11 = por %p3577_p10, %p3576_p4 }
  0x7b   : > { %p3572_p9 = pneg %p3571_p7 }
  0x7d   : > { %p3579_p12 = pnand %p3578_p11, %p3572_p9 }
  0x7f   : > { %3582 = shalt.err (!%p3579_p12)
}
  0x80   : > { %3154 = dma.hbm_to_vmem [thread:$0]  (!%p3804_p6), %s4462_s9, 1024, %s374_s13, [#allocation12], %s4468_s30, %s4468_s30, %s4469_s12  }
  0x81   : > { %s2767_s27 = sadd.s32 4294967294, %s3691_s20   ;;  %s3940_s16 = sadd.s32 1, %s3691_s20  }
  0x82   : > { %s37_s10 = sadd.s32 1, %s3687_s19  ;;  %s34_s14 = ssub.s32 %s3691_s20, %s3940_s16 }
  0x83   : > { %p44_p8 = scmp.ne.s32.totalorder %s3687_s19, %s3683_s18  ;;  %p35_p1 = scmp.eq.s32.totalorder %s34_s14, 0 }
  0x84   : > { %p45_p3 = scmp.eq.s32.totalorder %s3691_s20, 0  ;;  %p50_p13 = scmp.ne.s32.totalorder %s3683_s18, %s3679_s17 }
  0x85   : > { %p284_p0 = scmp.eq.s32.totalorder %s3788_s23, 1  ;;  %p4477_p5 = scmp.eq.s32.totalorder %s3788_s23, 0 }
  0x86   : > { %s3952_s15 = scalar_select %p35_p1, %s3687_s19, %s37_s10  }
  0x87   : > { %p46_p2 = por %p45_p3, %p44_p8  ;;  %p3956_p7 = por %p4477_p5, %p50_p13 }
  0x88   : > { %p3960_p6 = por %p284_p0, %p44_p8  ;;  %p290_p9 = scmp.eq.s32.totalorder %s2767_s27, 1 }
  0x89   : > { %p3168_p4 = scmp.lt.s32.totalorder %s3691_s20, 2  ;;  %s390_s25 = sand.u32 1, %s3687_s19  }
  0x8a   : > { %s4479_s13 = scalar_select %p3960_p6, 1, 0 }
  0x8b   : > { %p3966_p10 = por %p290_p9, %p50_p13  ;;  %s2775_s26 = sshll.u32 %s390_s25, 7 }
  0x8c   : > { %s2913_s29 = sshll.u32 %s3691_s20, 11  ;;  %s394_s10 = scalar_lea.vmem [#allocation2], %s2775_s26 }
  0x8d   : > { %s4480_s28 = scalar_select %p3966_p10, 1, 0 }
  0x8e   : > { %s3974_s8 = scalar_lea.hbm %s4453_s0, %s2913_s29  ;;  %s401_s14 = sshll.u32 %s394_s10, 4  ;;  %s3980_s14 = int_to_ptr.vmem [resolvable:$true] %s401_s14 }
  0x8f   : > { %p3976_p11 = pnand %p3168_p4, %p46_p2  ;;  %s3982_s30 = scalar_lea.sflag [#allocation3], %s390_s25 }
  0x90   : > { %s3583_s12 = scalar_lea.hbm %s3974_s8, 2048  ;;  %s3588_s11 = scalar_lea.hbm %s4453_s0, 4096 }
  0x91   : > { %p3584_p12 = scmp.ne.s32.totalorder %s3974_s8, %s3583_s12  ;;  %p3585_p8 = pneg %p3976_p11 }
  0x92   : > { %p3589_p13 = scmp.lt.u32.totalorder %s3974_s8, %s4453_s0  ;;  %p3590_p0 = scmp.lt.u32.totalorder %s3588_s11, %s3583_s12 }
  0x93   : > { %p3586_p1 = pnand %p3585_p8, %p3584_p12  ;;  %p3592_p5 = scmp.lt.u32.totalorder %s3583_s12, %s3974_s8 }
  0x94   : > { %p3591_p2 = por %p3590_p0, %p3589_p13 }
  0x95   : > { %p3587_p3 = pneg %p3586_p1 }
  0x96   : > { %p3593_p9 = por %p3592_p5, %p3591_p2 }
  0x98   : > { %p3594_p4 = pnand %p3593_p9, %p3587_p3 }
  0x9a   : > { %3597 = shalt.err (!%p3594_p4)
}
  0x9b   : > { %s3598_s25 = scalar_lea.vmem %s3980_s14, 2048  ;;  %s3702_s26 = smov [#allocation2]  }
  0x9c   : > { %p3599_p12 = scmp.ne.s32.totalorder %s3980_s14, %s3598_s25  ;;  %s3603_s29 = sshll.u32 %s3702_s26, 4  ;;  %s3604_s29 = int_to_ptr.vmem [resolvable:$false] %s3603_s29 }
  0x9d   : > { %s3605_s22 = scalar_lea.vmem %s3604_s29, 4096  ;;  %p3606_p6 = scmp.lt.s32.totalorder %s3980_s14, %s3604_s29 }
  0x9e   : > { %p3601_p1 = pnand %p3599_p12, %p3585_p8  ;;  %p3607_p13 = scmp.lt.s32.totalorder %s3605_s22, %s3598_s25 }
  0xa0   : > { %p3602_p10 = pneg %p3601_p1  ;;  %p3608_p0 = por %p3607_p13, %p3606_p6 }
  0xa2   : > { %p3609_p2 = pnand %p3608_p0, %p3602_p10 }
  0xa4   : > { %3612 = shalt.err (!%p3609_p2)
}
  0xa5   : > { %s4482_s12 = smov 4   ;;  %s4483_s11 = smov 64  }
  0xa6   : > { %3158 = dma.hbm_to_vmem [thread:$0]  (!%p3976_p11), %s3974_s8, 2048, %s3980_s14, %s3982_s30, %s4483_s11, %s4483_s11, %s4482_s12  }
  0xa7   : > { %p4484_p8 = scmp.ne.s32.totalorder %s4474_s24, 0 }
  0xa8   : > { %s4016_s10 = sand.u32 (!%p4484_p8), 1, %s3683_s18  }
  0xa9   : > { %413 = sbr.rel (%p4484_p8) target bundleno = 1472 (0x5c0), region = 64  ;;  %s2779_s25 = sshll.u32 (!%p4484_p8), %s4016_s10, 7 }
  0xaa   : > { %s416_s26 = scalar_lea.sflag (!%p4484_p8), [#allocation3], %s4016_s10  ;;  %s4020_s29 = scalar_lea.vmem (!%p4484_p8), [#allocation2], %s2779_s25 }
  0xb0   : > { %3658 = dma.done.wait (%p3956_p7), %s416_s26, 2048  }
  0xb1   : > { %3660 = vsyncadd (%p3956_p7), %s416_s26, 4294965248  ;;  %p4485_p6 = scmp.eq.s32.totalorder %s3788_s23, 0 }
  0xb3   : > { %3662 = dma.done.wait (%p4485_p6), [#allocation6], 6144   ;;  %p4486_p10 = pmov %p4485_p6 }
  0xb4   : > { %p4487_p11 = pmov %p4485_p6 }
  0xb5   : > { %3664 = vsyncadd (%p4486_p10), [#allocation6], 4294961152 }
  0xb6   : > { %3666 = dma.done.wait (%p4487_p11), [#allocation9], 6144   ;;  %p4488_p3 = pmov %p4485_p6 }
  0xb8   : > { %3668 = vsyncadd (%p4488_p3), [#allocation9], 4294961152  ;;  %p4489_p5 = pmov %p4488_p3 }
  0xb9   : > { %p4490_p9 = pmov %p4488_p3 }
  0xba   : > { %3670 = dma.done.wait (%p4489_p5), [#allocation12], 1024  }
  0xbb   : > { %3672 = vsyncadd (%p4490_p9), [#allocation12], 4294966272  ;;  %v3703_v0 = vmov 0   ;;  %v3219_v1 = vld [vmem:[#allocation5 + $0x4] ss:$8 sps:$4 sm:$0xff]   ;;  %v3245_v30 = vld [vmem:[%s4020_s29 + $0x10] sm:$0xff]  }
  0xbc   : > { %749 = vmatprep.mubr.bf16.mxu0 %v3703_v0  ;;  %v3221_v2 = vld [vmem:[#allocation5] ss:$8 sps:$4 sm:$0xff]   ;;  %717 = vmatprep.subr.bf16.mxu0 %v3219_v1  ;;  %v3222_v3 = vld [vmem:[#allocation5 + $0x14] ss:$8 sps:$4 sm:$0xff]   ;;  %v3224_v4 = vld [vmem:[#allocation5 + $0x10] ss:$8 sps:$4 sm:$0xff]  }
  0xbd   : > { %718 = vmatpush1.bf16.msra.mxu0 %v3221_v2  ;;  %v3225_v5 = vld [vmem:[#allocation5 + $0x24] ss:$8 sps:$4 sm:$0xff]   ;;  %v3227_v6 = vld [vmem:[#allocation5 + $0x20] ss:$8 sps:$4 sm:$0xff]   ;;  %v3228_v7 = vld [vmem:[#allocation5 + $0x34] ss:$8 sps:$4 sm:$0xff]  }
  0xbe   : > { %719 = vmatprep.subr.bf16.mxu0 %v3222_v3  ;;  %v3230_v8 = vld [vmem:[#allocation5 + $0x30] ss:$8 sps:$4 sm:$0xff]   ;;  %v3231_v9 = vld [vmem:[#allocation5 + $0x44] ss:$8 sps:$4 sm:$0xff]   ;;  %v3233_v10 = vld [vmem:[#allocation5 + $0x40] ss:$8 sps:$4 sm:$0xff]  }
  0xbf   : > { %v3234_v11 = vld [vmem:[#allocation5 + $0x54] ss:$8 sps:$4 sm:$0xff]   ;;  %v3236_v12 = vld [vmem:[#allocation5 + $0x50] ss:$8 sps:$4 sm:$0xff]   ;;  %v3237_v13 = vld [vmem:[#allocation5 + $0x64] ss:$8 sps:$4 sm:$0xff]  }
  0xc0   : > { %v3239_v14 = vld [vmem:[#allocation5 + $0x60] ss:$8 sps:$4 sm:$0xff]   ;;  %v3240_v15 = vld [vmem:[#allocation5 + $0x74] ss:$8 sps:$4 sm:$0xff]   ;;  %v3242_v16 = vld [vmem:[#allocation5 + $0x70] ss:$8 sps:$4 sm:$0xff]  }
  0xc1   : > { %720 = vmatpush1.bf16.msra.mxu0 %v3224_v4  ;;  %v3259_v17 = vld [vmem:[#allocation7 + $0x4] ss:$8 sps:$4 sm:$0xff]   ;;  %v3261_v18 = vld [vmem:[#allocation7] ss:$8 sps:$4 sm:$0xff]   ;;  %v3262_v19 = vld [vmem:[#allocation7 + $0x14] ss:$8 sps:$4 sm:$0xff]   ;;  %v531_v4 = vlaneseq }
  0xc2   : > { %721 = vmatprep.subr.bf16.mxu0 %v3225_v5  ;;  %1210 = vmatprep.subr.bf16.mxu1 %v3259_v17  ;;  %v3243_v20 = vld [vmem:[%s4020_s29] sm:$0xff]   ;;  %v3264_v21 = vld [vmem:[#allocation7 + $0x10] ss:$8 sps:$4 sm:$0xff]   ;;  %v3268_v24 = vld [vmem:[#allocation7 + $0x34] ss:$8 sps:$4 sm:$0xff]   ;;  %s4491_s11 = sld [smem:[#allocation19_spill]] }
  0xc3   : > { %1211 = vmatpush1.bf16.msra.mxu1 %v3261_v18  ;;  %v3265_v22 = vld [vmem:[#allocation7 + $0x24] ss:$8 sps:$4 sm:$0xff]   ;;  %v3267_v23 = vld [vmem:[#allocation7 + $0x20] ss:$8 sps:$4 sm:$0xff]   ;;  %v3270_v26 = vld [vmem:[#allocation7 + $0x30] ss:$8 sps:$4 sm:$0xff]  }
  0xc4   : > { %1212 = vmatprep.subr.bf16.mxu1 %v3262_v19  ;;  %v3244_v25 = vld [vmem:[%s4020_s29 + $0x8] sm:$0xff]   ;;  %v3274_v29 = vld [vmem:[#allocation7 + $0x54] ss:$8 sps:$4 sm:$0xff]   ;;  %v3276_v31 = vld [vmem:[#allocation7 + $0x50] ss:$8 sps:$4 sm:$0xff]   ;;  %s2785_s24 = sshll.u32 %s4016_s10, 8 }
  0xc5   : > { %722 = vmatpush1.bf16.msra.mxu0 %v3227_v6  ;;  %v3271_v27 = vld [vmem:[#allocation7 + $0x44] ss:$8 sps:$4 sm:$0xff]   ;;  %v3273_v28 = vld [vmem:[#allocation7 + $0x40] ss:$8 sps:$4 sm:$0xff]   ;;  %v3280_v34 = vld [vmem:[#allocation7 + $0x74] ss:$8 sps:$4 sm:$0xff]  }
  0xc6   : > { %723 = vmatprep.subr.bf16.mxu0 %v3228_v7  ;;  %v3277_v32 = vld [vmem:[#allocation7 + $0x64] ss:$8 sps:$4 sm:$0xff]   ;;  %v3279_v33 = vld [vmem:[#allocation7 + $0x60] ss:$8 sps:$4 sm:$0xff]   ;;  %v3246_v35 = vld [vmem:[%s4020_s29 + $0x18] sm:$0xff]   ;;  %v532_v7 = vshrl.u32 %v531_v4, 7 }
  0xc7   : > { %1213 = vmatpush1.bf16.msra.mxu1 %v3264_v21  ;;  %v3282_v36 = vld [vmem:[#allocation7 + $0x70] ss:$8 sps:$4 sm:$0xff]   ;;  %v3283_v37 = vld [vmem:[#allocation7 + $0x84] ss:$8 sps:$4 sm:$0xff]   ;;  %v3285_v38 = vld [vmem:[#allocation7 + $0x80] ss:$8 sps:$4 sm:$0xff]  }
  0xc8   : > { %1214 = vmatprep.subr.bf16.mxu1 %v3265_v22  ;;  %v3286_v39 = vld [vmem:[#allocation7 + $0x94] ss:$8 sps:$4 sm:$0xff]   ;;  %v3247_v40 = vld [vmem:[%s4020_s29 + $0x20] sm:$0xff]   ;;  %v3288_v41 = vld [vmem:[#allocation7 + $0x90] ss:$8 sps:$4 sm:$0xff]   ;;  %s4340_s30 = scalar_lea.vmem [#allocation13], %s2785_s24 }
  0xc9   : > { %724 = vmatpush1.bf16.msra.mxu0 %v3230_v8  ;;  %v3289_v42 = vld [vmem:[#allocation7 + $0xa4] ss:$8 sps:$4 sm:$0xff]   ;;  %v3291_v43 = vld [vmem:[#allocation7 + $0xa0] ss:$8 sps:$4 sm:$0xff]   ;;  %v3292_v44 = vld [vmem:[#allocation7 + $0xb4] ss:$8 sps:$4 sm:$0xff]  }
  0xca   : > { %725 = vmatprep.subr.bf16.mxu0 %v3231_v9  ;;  %v3248_v45 = vld [vmem:[%s4020_s29 + $0x28] sm:$0xff]   ;;  %v3294_v46 = vld [vmem:[#allocation7 + $0xb0] ss:$8 sps:$4 sm:$0xff]   ;;  %v3298_v49 = vld [vmem:[#allocation7 + $0xd4] ss:$8 sps:$4 sm:$0xff]   ;;  %v4070_v8 = vsub.s32 0, %v532_v7 }
  0xcb   : > { %1215 = vmatpush1.bf16.msra.mxu1 %v3267_v23  ;;  %v3295_v47 = vld [vmem:[#allocation7 + $0xc4] ss:$8 sps:$4 sm:$0xff]   ;;  %v3297_v48 = vld [vmem:[#allocation7 + $0xc0] ss:$8 sps:$4 sm:$0xff]   ;;  %v3249_v50 = vld [vmem:[%s4020_s29 + $0x30] sm:$0xff]   ;;  %s2914_s21 = sshll.u32 %s3788_s23, 12 }
  0xcc   : > { %1216 = vmatprep.subr.bf16.mxu1 %v3268_v24  ;;  %v3250_v51 = vld [vmem:[%s4020_s29 + $0x38] sm:$0xff]   ;;  %v3251_v52 = vld [vmem:[%s4020_s29 + $0x40] sm:$0xff]   ;;  %v3252_v53 = vld [vmem:[%s4020_s29 + $0x48] sm:$0xff]   ;;  %s2646_s8 = sshll.u32 %s4340_s30, 4  ;;  %s4493_s22 = sld [smem:[#allocation21_spill]]  ;;  %s4406_s8 = int_to_ptr.vmem [resolvable:$true] %s2646_s8 }
  0xcd   : > { %726 = vmatpush1.bf16.msra.mxu0 %v3233_v10  ;;  %v3253_v54 = vld [vmem:[%s4020_s29 + $0x50] sm:$0xff]   ;;  %v3254_v56 = vld [vmem:[%s4020_s29 + $0x58] sm:$0xff]   ;;  %v3301_v57 = vld [vmem:[#allocation7 + $0xe4] ss:$8 sps:$4 sm:$0xff]   ;;  %v4075_v10 = vsub.s32 1, %v532_v7  ;;  %s2633_s23 = scalar_lea.sflag [#allocation4], %s4016_s10 }
  0xce   : > { %727 = vmatprep.subr.bf16.mxu0 %v3234_v11  ;;  %v3300_v55 = vld [vmem:[#allocation7 + $0xd0] ss:$8 sps:$4 sm:$0xff]   ;;  %v3303_v58 = vld [vmem:[#allocation7 + $0xe0] ss:$8 sps:$4 sm:$0xff]   ;;  %v3304_v59 = vld [vmem:[#allocation7 + $0xf4] ss:$8 sps:$4 sm:$0xff]  }
  0xcf   : > { %1217 = vmatpush1.bf16.msra.mxu1 %v3270_v26  ;;  %v3306_v60 = vld [vmem:[#allocation7 + $0xf0] ss:$8 sps:$4 sm:$0xff]   ;;  %v3255_v61 = vld [vmem:[%s4020_s29 + $0x60] sm:$0xff]   ;;  %v3256_v62 = vld [vmem:[%s4020_s29 + $0x68] sm:$0xff]   ;;  %p4494_p4 = scmp.ne.s32.totalorder %s4479_s13, 0  ;;  %s3704_s25 = smov [#allocation13]  }
  0xd0   : > { %1218 = vmatprep.subr.bf16.mxu1 %v3271_v27  ;;  %v3257_v63 = vld [vmem:[%s4020_s29 + $0x70] sm:$0xff]   ;;  %v3258_v1 = vld [vmem:[%s4020_s29 + $0x78] sm:$0xff]   ;;  %v3307_v2 = vld [vmem:[#allocation8] ss:$8 sps:$4 sm:$0xff]   ;;  %s4492_s29 = sld [smem:[#allocation20_spill]]  ;;  %s3617_s26 = sshll.u32 %s3704_s25, 4  ;;  %s3618_s26 = int_to_ptr.vmem [resolvable:$false] %s3617_s26 }
  0xd1   : > { %728 = vmatpush1.bf16.msra.mxu0 %v3236_v12  ;;  %v3309_v3 = vld [vmem:[#allocation8 + $0x4] ss:$8 sps:$4 sm:$0xff]   ;;  %v3310_v5 = vld [vmem:[#allocation8 + $0x10] ss:$8 sps:$4 sm:$0xff]   ;;  %v3312_v6 = vld [vmem:[#allocation8 + $0x14] ss:$8 sps:$4 sm:$0xff]   ;;  %p3620_p13 = scmp.lt.s32.totalorder %s4406_s8, %s3618_s26 }
  0xd2   : > { %729 = vmatprep.subr.bf16.mxu0 %v3237_v13  ;;  %v529_v9 = vld [vmem:[%s4455_s2] sm:$0x3]  ;;  %v3315_v11 = vld [vmem:[#allocation8 + $0x24] ss:$8 sps:$4 sm:$0xff]   ;;  %v3324_v26 = vld [vmem:[#allocation8 + $0x54] ss:$8 sps:$4 sm:$0xff]   ;;  %s4404_s12 = scalar_lea.hbm %s4493_s22, %s2914_s21 }
  0xd3   : > { %1219 = vmatpush1.bf16.msra.mxu1 %v3273_v28  ;;  %v4078_v12 = vrot.slane %v529_v9, %v4070_v8  ;;  %v4081_v13 = vrot.slane %v529_v9, %v4075_v10  ;;  %v3319_v23 = vld [vmem:[#allocation8 + $0x40] ss:$8 sps:$4 sm:$0xff]   ;;  %v3321_v24 = vld [vmem:[#allocation8 + $0x44] ss:$8 sps:$4 sm:$0xff]  }
  0xd4   : > { %1220 = vmatprep.subr.bf16.mxu1 %v3274_v29  ;;  %v3339_v9 = vld [vmem:[#allocation8 + $0xa4] ss:$8 sps:$4 sm:$0xff]  }
  0xd5   : > { %730 = vmatpush1.bf16.msra.mxu0 %v3239_v14 }
  0xd6   : > { %731 = vmatprep.subr.bf16.mxu0 %v3240_v15  ;;  %v3316_v15 = vld [vmem:[#allocation8 + $0x30] ss:$8 sps:$4 sm:$0xff]  }
  0xd7   : > { %1221 = vmatpush1.bf16.msra.mxu1 %v3276_v31 }
  0xd8   : > { %1222 = vmatprep.subr.bf16.mxu1 %v3277_v32  ;;  %v3322_v32 = vld [vmem:[#allocation8 + $0x50] ss:$8 sps:$4 sm:$0xff]  }
  0xd9   : > { %732 = vmatpush1.bf16.msra.mxu0 %v3242_v16  ;;  %v3318_v16 = vld [vmem:[#allocation8 + $0x34] ss:$8 sps:$4 sm:$0xff]  }
  0xda   : > { %1703 = vmatprep.subr.bf16.mxu0 %v3309_v3 }
  0xdb   : > { %1223 = vmatpush1.bf16.msra.mxu1 %v3279_v33 }
  0xdc   : > { %750 = vmatmul.mubr.bf16.vlgmr.msra.gmra.mrb[0].mxu0 %v3243_v20  ;;  %1224 = vmatprep.subr.bf16.mxu1 %v3280_v34 }
  0xdd   : > { %759 = vmatprep.mubr.bf16.mxu0 %v3703_v0  ;;  %1704 = vmatpush1.bf16.msra.mxu0 %v3307_v2 }
  0xde   : > { %1705 = vmatprep.subr.bf16.mxu0 %v3312_v6 }
  0xdf   : > { %1225 = vmatpush1.bf16.msra.mxu1 %v3282_v36 }
  0xe0   : > { %1226 = vmatprep.subr.bf16.mxu1 %v3283_v37 }
  0xe1   : > { %1706 = vmatpush1.bf16.msra.mxu0 %v3310_v5  ;;  %v3334_v5 = vld [vmem:[#allocation8 + $0x90] ss:$8 sps:$4 sm:$0xff]  }
  0xe2   : > { %1707 = vmatprep.subr.bf16.mxu0 %v3315_v11 }
  0xe3   : > { %1227 = vmatpush1.bf16.msra.mxu1 %v3285_v38 }
  0xe4   : > { %760 = vmatmul.mubr.bf16.gmra.mrb[4].mxu0 %v3244_v25  ;;  %1228 = vmatprep.subr.bf16.mxu1 %v3286_v39 }
  0xe5   : > { %769 = vmatprep.mubr.bf16.mxu0 %v3703_v0 }
  0xe7   : > { %1229 = vmatpush1.bf16.msra.mxu1 %v3288_v41 }
  0xe8   : > { %1230 = vmatprep.subr.bf16.mxu1 %v3289_v42  ;;  %v3325_v42 = vld [vmem:[#allocation8 + $0x60] ss:$8 sps:$4 sm:$0xff]  }
  0xeb   : > { %1231 = vmatpush1.bf16.msra.mxu1 %v3291_v43 }
  0xec   : > { %770 = vmatmul.mubr.bf16.gmra.mrb[8].mxu0 %v3245_v30  ;;  %1232 = vmatprep.subr.bf16.mxu1 %v3292_v44  ;;  %v3330_v44 = vld [vmem:[#allocation8 + $0x74] ss:$8 sps:$4 sm:$0xff]  }
  0xed   : > { %779 = vmatprep.mubr.bf16.mxu0 %v3703_v0 }
  0xef   : > { %1233 = vmatpush1.bf16.msra.mxu1 %v3294_v46 }
  0xf0   : > { %1234 = vmatprep.subr.bf16.mxu1 %v3295_v47 }
  0xf3   : > { %1235 = vmatpush1.bf16.msra.mxu1 %v3297_v48 }
  0xf4   : > { %780 = vmatmul.mubr.bf16.gmra.mrb[12].mxu0 %v3246_v35  ;;  %1236 = vmatprep.subr.bf16.mxu1 %v3298_v49  ;;  %v3327_v35 = vld [vmem:[#allocation8 + $0x64] ss:$8 sps:$4 sm:$0xff]  }
  0xf5   : > { %789 = vmatprep.mubr.bf16.mxu0 %v3703_v0 }
  0xf7   : > { %1237 = vmatpush1.bf16.msra.mxu1 %v3300_v55 }
  0xf8   : > { %1238 = vmatprep.subr.bf16.mxu1 %v3301_v57 }
  0xfb   : > { %1239 = vmatpush1.bf16.msra.mxu1 %v3303_v58 }
  0xfc   : > { %790 = vmatmul.mubr.bf16.gmra.mrb[16].mxu0 %v3247_v40  ;;  %1240 = vmatprep.subr.bf16.mxu1 %v3304_v59 }
  0xfd   : > { %799 = vmatprep.mubr.bf16.mxu0 %v3703_v0 }
  0xff   : > { %1241 = vmatpush1.bf16.msra.mxu1 %v3306_v60  ;;  %v3331_v60 = vld [vmem:[#allocation8 + $0x80] ss:$8 sps:$4 sm:$0xff]  }
 0x104   : > { %800 = vmatmul.mubr.bf16.gmra.mrb[20].mxu0 %v3248_v45 }
 0x105   : > { %809 = vmatprep.mubr.bf16.mxu0 %v3703_v0 }
 0x10c   : > { %810 = vmatmul.mubr.bf16.gmra.mrb[24].mxu0 %v3249_v50  ;;  %v3328_v50 = vld [vmem:[#allocation8 + $0x70] ss:$8 sps:$4 sm:$0xff]  }
 0x10d   : > { %819 = vmatprep.mubr.bf16.mxu0 %v3703_v0 }
 0x114   : > { %820 = vmatmul.mubr.bf16.gmra.mrb[28].mxu0 %v3250_v51 }
 0x115   : > { %829 = vmatprep.mubr.bf16.mxu0 %v3703_v0 }
 0x11c   : > { %830 = vmatmul.mubr.bf16.gmra.mrb[32].mxu0 %v3251_v52 }
 0x11d   : > { %839 = vmatprep.mubr.bf16.mxu0 %v3703_v0 }
 0x124   : > { %840 = vmatmul.mubr.bf16.gmra.mrb[36].mxu0 %v3252_v53  ;;  %v3333_v53 = vld [vmem:[#allocation8 + $0x84] ss:$8 sps:$4 sm:$0xff]  }
 0x125   : > { %849 = vmatprep.mubr.bf16.mxu0 %v3703_v0 }
 0x12c   : > { %850 = vmatmul.mubr.bf16.gmra.mrb[40].mxu0 %v3253_v54 }
 0x12d   : > { %859 = vmatprep.mubr.bf16.mxu0 %v3703_v0 }
 0x134   : > { %860 = vmatmul.mubr.bf16.gmra.mrb[44].mxu0 %v3254_v56 }
 0x135   : > { %869 = vmatprep.mubr.bf16.mxu0 %v3703_v0 }
 0x13c   : > { %870 = vmatmul.mubr.bf16.gmra.mrb[48].mxu0 %v3255_v61 }
 0x13d   : > { %879 = vmatprep.mubr.bf16.mxu0 %v3703_v0 }
 0x144   : > { %880 = vmatmul.mubr.bf16.gmra.mrb[52].mxu0 %v3256_v62  ;;  %v3336_v62 = vld [vmem:[#allocation8 + $0x94] ss:$8 sps:$4 sm:$0xff]  }
 0x145   : > { %889 = vmatprep.mubr.bf16.mxu0 %v3703_v0 }
 0x14c   : > { %890 = vmatmul.mubr.bf16.gmra.mrb[56].mxu0 %v3257_v63 }
 0x14d   : > { %899 = vmatprep.mubr.bf16.mxu0 %v3703_v0  ;;  %v3313_v0 = vld [vmem:[#allocation8 + $0x20] ss:$8 sps:$4 sm:$0xff]  }
 0x14e   : > { %1708 = vmatpush1.bf16.msra.mxu0 %v3313_v0 }
 0x14f   : > { %1709 = vmatprep.subr.bf16.mxu0 %v3318_v16 }
 0x152   : > { %1710 = vmatpush1.bf16.msra.mxu0 %v3316_v15 }
 0x153   : > { %1711 = vmatprep.subr.bf16.mxu0 %v3321_v24 }
 0x154   : > { %900 = vmatmul.mubr.bf16.gmra.mrb[60].mxu0 %v3258_v1 }
 0x156   : > { %1712 = vmatpush1.bf16.msra.mxu0 %v3319_v23 }
 0x157   : > { %1713 = vmatprep.subr.bf16.mxu0 %v3324_v26  ;;  %v3340_v26 = vld [vmem:[#allocation8 + $0xb0] ss:$8 sps:$4 sm:$0xff]  }
 0x15a   : > { %1714 = vmatpush1.bf16.msra.mxu0 %v3322_v32 }
 0x15b   : > { %1715 = vmatprep.subr.bf16.mxu0 %v3327_v35 }
 0x15e   : > { %1716 = vmatpush1.bf16.msra.mxu0 %v3325_v42 }
 0x15f   : > { %1717 = vmatprep.subr.bf16.mxu0 %v3330_v44  ;;  %v3346_v44 = vld [vmem:[#allocation8 + $0xd0] ss:$8 sps:$4 sm:$0xff]  }
 0x162   : > { %1718 = vmatpush1.bf16.msra.mxu0 %v3328_v50 }
 0x163   : > { %1719 = vmatprep.subr.bf16.mxu0 %v3333_v53 }
 0x166   : > { %1720 = vmatpush1.bf16.msra.mxu0 %v3331_v60 }
 0x167   : > { %1721 = vmatprep.subr.bf16.mxu0 %v3336_v62 }
 0x16a   : > { %1722 = vmatpush1.bf16.msra.mxu0 %v3334_v5 }
 0x16b   : > { %1723 = vmatprep.subr.bf16.mxu0 %v3339_v9 }
 0x1af   : > { %v751_v14 = vpop.f32.mrb[0].mxu0 }
 0x1b0   : > { %v752_v17 = vadd.f32 %v751_v14, %v4078_v12  ;;  %v753_v18 = vpop.f32.mrb[1].mxu0 }
 0x1b1   : > { %v754_v19 = vadd.f32 %v753_v18, %v4081_v13  ;;  %v755_v20 = vpop.f32.mrb[2].mxu0  ;;  %v3337_v18 = vld [vmem:[#allocation8 + $0xa0] ss:$8 sps:$4 sm:$0xff]  }
 0x1b2   : > { %v756_v21 = vadd.f32 %v755_v20, %v4078_v12  ;;  %v757_v22 = vpop.f32.mrb[3].mxu0  ;;  %v910_v27 = vmax.f32 %v752_v17, 0.0  ;;  %v3342_v20 = vld [vmem:[#allocation8 + $0xb4] ss:$8 sps:$4 sm:$0xff]   ;;  %1724 = vmatpush1.bf16.msra.mxu0 %v3337_v18 }
 0x1b3   : > { %v758_v25 = vadd.f32 %v757_v22, %v4081_v13  ;;  %v911_v29 = vmax.f32 %v754_v19, 0.0  ;;  %1725 = vmatprep.subr.bf16.mxu0 %v3342_v20 }
 0x1b4   : > { %v912_v28 = vmax.f32 %v756_v21, 0.0 }
 0x1b5   : > { %v913_v30 = vmax.f32 %v758_v25, 0.0 }
 0x1b6   : > { %v974_v31 = vpack.c.bf16 %v912_v28, %v910_v27  ;;  %1726 = vmatpush1.bf16.msra.mxu0 %v3340_v26 }
 0x1b7   : > { %v761_v33 = vpop.f32.mrb[4].mxu0  ;;  %v975_v34 = vpack.c.bf16 %v913_v30, %v911_v29  ;;  %v3345_v29 = vld [vmem:[#allocation8 + $0xc4] ss:$8 sps:$4 sm:$0xff]  }
 0x1b8   : > { %v762_v36 = vadd.f32 %v761_v33, %v4078_v12  ;;  %v763_v37 = vpop.f32.mrb[5].mxu0  ;;  %1727 = vmatprep.subr.bf16.mxu0 %v3345_v29 }
 0x1b9   : > { %v764_v38 = vadd.f32 %v763_v37, %v4081_v13  ;;  %v765_v39 = vpop.f32.mrb[6].mxu0  ;;  %1242 = vmatprep.mubr.bf16.mxu1 %v975_v34 }
 0x1ba   : > { %v766_v40 = vadd.f32 %v765_v39, %v4078_v12  ;;  %v767_v41 = vpop.f32.mrb[7].mxu0  ;;  %1243 = vmatmul.mubr.bf16.vlgmr.msra.gmra.mrb[0].mxu1 %v974_v31  ;;  %v914_v45 = vmax.f32 %v762_v36, 0.0  ;;  %v3343_v36 = vld [vmem:[#allocation8 + $0xc0] ss:$8 sps:$4 sm:$0xff]  }
 0x1bb   : > { %v768_v43 = vadd.f32 %v767_v41, %v4081_v13  ;;  %v915_v47 = vmax.f32 %v764_v38, 0.0  ;;  %v3348_v38 = vld [vmem:[#allocation8 + $0xd4] ss:$8 sps:$4 sm:$0xff]   ;;  %1728 = vmatpush1.bf16.msra.mxu0 %v3343_v36 }
 0x1bc   : > { %v916_v46 = vmax.f32 %v766_v40, 0.0  ;;  %1729 = vmatprep.subr.bf16.mxu0 %v3348_v38 }
 0x1bd   : > { %v917_v48 = vmax.f32 %v768_v43, 0.0 }
 0x1be   : > { %v976_v49 = vpack.c.bf16 %v916_v46, %v914_v45 }
 0x1bf   : > { %v977_v51 = vpack.c.bf16 %v917_v48, %v915_v47  ;;  %v771_v52 = vpop.f32.mrb[8].mxu0  ;;  %v3351_v47 = vld [vmem:[#allocation8 + $0xe4] ss:$8 sps:$4 sm:$0xff]   ;;  %1730 = vmatpush1.bf16.msra.mxu0 %v3346_v44 }
 0x1c0   : > { %v772_v54 = vadd.f32 %v771_v52, %v4078_v12  ;;  %v773_v55 = vpop.f32.mrb[9].mxu0  ;;  %1731 = vmatprep.subr.bf16.mxu0 %v3351_v47 }
 0x1c1   : > { %v774_v56 = vadd.f32 %v773_v55, %v4081_v13  ;;  %v775_v57 = vpop.f32.mrb[10].mxu0  ;;  %1252 = vmatprep.mubr.bf16.mxu1 %v977_v51 }
 0x1c2   : > { %v776_v58 = vadd.f32 %v775_v57, %v4078_v12  ;;  %v777_v59 = vpop.f32.mrb[11].mxu0  ;;  %1253 = vmatmul.mubr.bf16.gmra.mrb[4].mxu1 %v976_v49  ;;  %v918_v63 = vmax.f32 %v772_v54, 0.0  ;;  %v3349_v54 = vld [vmem:[#allocation8 + $0xe0] ss:$8 sps:$4 sm:$0xff]  }
 0x1c3   : > { %v778_v61 = vadd.f32 %v777_v59, %v4081_v13  ;;  %v919_v2 = vmax.f32 %v774_v56, 0.0  ;;  %1732 = vmatpush1.bf16.msra.mxu0 %v3349_v54 }
 0x1c4   : > { %v920_v1 = vmax.f32 %v776_v58, 0.0 }
 0x1c5   : > { %v921_v3 = vmax.f32 %v778_v61, 0.0 }
 0x1c6   : > { %v978_v4 = vpack.c.bf16 %v920_v1, %v918_v63 }
 0x1c7   : > { %v979_v6 = vpack.c.bf16 %v921_v3, %v919_v2  ;;  %v781_v7 = vpop.f32.mrb[12].mxu0 }
 0x1c8   : > { %v782_v0 = vadd.f32 %v781_v7, %v4078_v12  ;;  %v783_v11 = vpop.f32.mrb[13].mxu0 }
 0x1c9   : > { %v784_v14 = vadd.f32 %v783_v11, %v4081_v13  ;;  %v785_v15 = vpop.f32.mrb[14].mxu0  ;;  %1262 = vmatprep.mubr.bf16.mxu1 %v979_v6 }
 0x1ca   : > { %v786_v16 = vadd.f32 %v785_v15, %v4078_v12  ;;  %v787_v17 = vpop.f32.mrb[15].mxu0  ;;  %1263 = vmatmul.mubr.bf16.gmra.mrb[8].mxu1 %v978_v4  ;;  %v922_v21 = vmax.f32 %v782_v0, 0.0 }
 0x1cb   : > { %v788_v19 = vadd.f32 %v787_v17, %v4081_v13  ;;  %v923_v23 = vmax.f32 %v784_v14, 0.0 }
 0x1cc   : > { %v924_v22 = vmax.f32 %v786_v16, 0.0 }
 0x1cd   : > { %v925_v24 = vmax.f32 %v788_v19, 0.0 }
 0x1ce   : > { %v980_v25 = vpack.c.bf16 %v924_v22, %v922_v21 }
 0x1cf   : > { %v981_v27 = vpack.c.bf16 %v925_v24, %v923_v23  ;;  %v791_v28 = vpop.f32.mrb[16].mxu0 }
 0x1d0   : > { %v792_v30 = vadd.f32 %v791_v28, %v4078_v12  ;;  %v793_v31 = vpop.f32.mrb[17].mxu0 }
 0x1d1   : > { %v794_v32 = vadd.f32 %v793_v31, %v4081_v13  ;;  %v795_v33 = vpop.f32.mrb[18].mxu0  ;;  %1272 = vmatprep.mubr.bf16.mxu1 %v981_v27 }
 0x1d2   : > { %v796_v34 = vadd.f32 %v795_v33, %v4078_v12  ;;  %v797_v35 = vpop.f32.mrb[19].mxu0  ;;  %1273 = vmatmul.mubr.bf16.gmra.mrb[12].mxu1 %v980_v25  ;;  %v926_v39 = vmax.f32 %v792_v30, 0.0 }
 0x1d3   : > { %v798_v37 = vadd.f32 %v797_v35, %v4081_v13  ;;  %v927_v41 = vmax.f32 %v794_v32, 0.0 }
 0x1d4   : > { %v928_v40 = vmax.f32 %v796_v34, 0.0 }
 0x1d5   : > { %v929_v42 = vmax.f32 %v798_v37, 0.0 }
 0x1d6   : > { %v982_v43 = vpack.c.bf16 %v928_v40, %v926_v39 }
 0x1d7   : > { %v983_v45 = vpack.c.bf16 %v929_v42, %v927_v41  ;;  %v801_v46 = vpop.f32.mrb[20].mxu0 }
 0x1d8   : > { %v802_v48 = vadd.f32 %v801_v46, %v4078_v12  ;;  %v803_v49 = vpop.f32.mrb[21].mxu0 }
 0x1d9   : > { %v804_v50 = vadd.f32 %v803_v49, %v4081_v13  ;;  %v805_v51 = vpop.f32.mrb[22].mxu0  ;;  %1282 = vmatprep.mubr.bf16.mxu1 %v983_v45 }
 0x1da   : > { %v806_v52 = vadd.f32 %v805_v51, %v4078_v12  ;;  %v807_v53 = vpop.f32.mrb[23].mxu0  ;;  %1283 = vmatmul.mubr.bf16.gmra.mrb[16].mxu1 %v982_v43  ;;  %v930_v56 = vmax.f32 %v802_v48, 0.0 }
 0x1db   : > { %v808_v55 = vadd.f32 %v807_v53, %v4081_v13  ;;  %v931_v58 = vmax.f32 %v804_v50, 0.0 }
 0x1dc   : > { %v932_v57 = vmax.f32 %v806_v52, 0.0 }
 0x1dd   : > { %v933_v59 = vmax.f32 %v808_v55, 0.0 }
 0x1de   : > { %v984_v60 = vpack.c.bf16 %v932_v57, %v930_v56 }
 0x1df   : > { %v985_v61 = vpack.c.bf16 %v933_v59, %v931_v58  ;;  %v811_v62 = vpop.f32.mrb[24].mxu0 }
 0x1e0   : > { %v812_v63 = vadd.f32 %v811_v62, %v4078_v12  ;;  %v813_v1 = vpop.f32.mrb[25].mxu0 }
 0x1e1   : > { %v814_v2 = vadd.f32 %v813_v1, %v4081_v13  ;;  %v815_v3 = vpop.f32.mrb[26].mxu0  ;;  %1292 = vmatprep.mubr.bf16.mxu1 %v985_v61 }
 0x1e2   : > { %v816_v4 = vadd.f32 %v815_v3, %v4078_v12  ;;  %v817_v5 = vpop.f32.mrb[27].mxu0  ;;  %1293 = vmatmul.mubr.bf16.gmra.mrb[20].mxu1 %v984_v60  ;;  %v934_v7 = vmax.f32 %v812_v63, 0.0 }
 0x1e3   : > { %v818_v6 = vadd.f32 %v817_v5, %v4081_v13  ;;  %v935_v0 = vmax.f32 %v814_v2, 0.0 }
 0x1e4   : > { %v936_v9 = vmax.f32 %v816_v4, 0.0 }
 0x1e5   : > { %v937_v11 = vmax.f32 %v818_v6, 0.0 }
 0x1e6   : > { %v986_v14 = vpack.c.bf16 %v936_v9, %v934_v7 }
 0x1e7   : > { %v987_v15 = vpack.c.bf16 %v937_v11, %v935_v0  ;;  %v821_v16 = vpop.f32.mrb[28].mxu0 }
 0x1e8   : > { %v822_v17 = vadd.f32 %v821_v16, %v4078_v12  ;;  %v823_v18 = vpop.f32.mrb[29].mxu0 }
 0x1e9   : > { %v824_v19 = vadd.f32 %v823_v18, %v4081_v13  ;;  %v825_v20 = vpop.f32.mrb[30].mxu0  ;;  %1302 = vmatprep.mubr.bf16.mxu1 %v987_v15 }
 0x1ea   : > { %v826_v21 = vadd.f32 %v825_v20, %v4078_v12  ;;  %v827_v22 = vpop.f32.mrb[31].mxu0  ;;  %1303 = vmatmul.mubr.bf16.gmra.mrb[24].mxu1 %v986_v14  ;;  %v938_v24 = vmax.f32 %v822_v17, 0.0 }
 0x1eb   : > { %v828_v23 = vadd.f32 %v827_v22, %v4081_v13  ;;  %v939_v26 = vmax.f32 %v824_v19, 0.0 }
 0x1ec   : > { %v940_v25 = vmax.f32 %v826_v21, 0.0 }
 0x1ed   : > { %v941_v27 = vmax.f32 %v828_v23, 0.0 }
 0x1ee   : > { %v988_v28 = vpack.c.bf16 %v940_v25, %v938_v24 }
 0x1ef   : > { %v989_v29 = vpack.c.bf16 %v941_v27, %v939_v26  ;;  %v831_v30 = vpop.f32.mrb[32].mxu0 }
 0x1f0   : > { %v832_v31 = vadd.f32 %v831_v30, %v4078_v12  ;;  %v833_v32 = vpop.f32.mrb[33].mxu0 }
 0x1f1   : > { %v834_v33 = vadd.f32 %v833_v32, %v4081_v13  ;;  %v835_v34 = vpop.f32.mrb[34].mxu0  ;;  %1312 = vmatprep.mubr.bf16.mxu1 %v989_v29 }
 0x1f2   : > { %v836_v35 = vadd.f32 %v835_v34, %v4078_v12  ;;  %v837_v36 = vpop.f32.mrb[35].mxu0  ;;  %1313 = vmatmul.mubr.bf16.gmra.mrb[28].mxu1 %v988_v28  ;;  %v942_v38 = vmax.f32 %v832_v31, 0.0 }
 0x1f3   : > { %v838_v37 = vadd.f32 %v837_v36, %v4081_v13  ;;  %v943_v40 = vmax.f32 %v834_v33, 0.0  ;;  %v3354_v33 = vld [vmem:[#allocation8 + $0xf4] ss:$8 sps:$4 sm:$0xff]  }
 0x1f4   : > { %v944_v39 = vmax.f32 %v836_v35, 0.0  ;;  %v3352_v35 = vld [vmem:[#allocation8 + $0xf0] ss:$8 sps:$4 sm:$0xff]   ;;  %1733 = vmatprep.subr.bf16.mxu0 %v3354_v33 }
 0x1f5   : > { %v945_v41 = vmax.f32 %v838_v37, 0.0  ;;  %1734 = vmatpush1.bf16.msra.mxu0 %v3352_v35 }
 0x1f6   : > { %v990_v42 = vpack.c.bf16 %v944_v39, %v942_v38 }
 0x1f7   : > { %v991_v43 = vpack.c.bf16 %v945_v41, %v943_v40  ;;  %v841_v44 = vpop.f32.mrb[36].mxu0 }
 0x1f8   : > { %v842_v45 = vadd.f32 %v841_v44, %v4078_v12  ;;  %v843_v46 = vpop.f32.mrb[37].mxu0 }
 0x1f9   : > { %v844_v47 = vadd.f32 %v843_v46, %v4081_v13  ;;  %v845_v48 = vpop.f32.mrb[38].mxu0  ;;  %1322 = vmatprep.mubr.bf16.mxu1 %v991_v43 }
 0x1fa   : > { %v846_v49 = vadd.f32 %v845_v48, %v4078_v12  ;;  %v847_v50 = vpop.f32.mrb[39].mxu0  ;;  %1323 = vmatmul.mubr.bf16.gmra.mrb[32].mxu1 %v990_v42  ;;  %v946_v52 = vmax.f32 %v842_v45, 0.0 }
 0x1fb   : > { %v848_v51 = vadd.f32 %v847_v50, %v4081_v13  ;;  %v947_v54 = vmax.f32 %v844_v47, 0.0 }
 0x1fc   : > { %v948_v53 = vmax.f32 %v846_v49, 0.0 }
 0x1fd   : > { %v949_v55 = vmax.f32 %v848_v51, 0.0 }
 0x1fe   : > { %v992_v56 = vpack.c.bf16 %v948_v53, %v946_v52 }
 0x1ff   : > { %v993_v57 = vpack.c.bf16 %v949_v55, %v947_v54  ;;  %v851_v58 = vpop.f32.mrb[40].mxu0 }
 0x200   : > { %v852_v59 = vadd.f32 %v851_v58, %v4078_v12  ;;  %v853_v60 = vpop.f32.mrb[41].mxu0 }
 0x201   : > { %v854_v61 = vadd.f32 %v853_v60, %v4081_v13  ;;  %v855_v62 = vpop.f32.mrb[42].mxu0  ;;  %1332 = vmatprep.mubr.bf16.mxu1 %v993_v57 }
 0x202   : > { %v856_v63 = vadd.f32 %v855_v62, %v4078_v12  ;;  %v857_v1 = vpop.f32.mrb[43].mxu0  ;;  %1333 = vmatmul.mubr.bf16.gmra.mrb[36].mxu1 %v992_v56  ;;  %v950_v3 = vmax.f32 %v852_v59, 0.0 }
 0x203   : > { %v858_v2 = vadd.f32 %v857_v1, %v4081_v13  ;;  %v951_v5 = vmax.f32 %v854_v61, 0.0 }
 0x204   : > { %v952_v4 = vmax.f32 %v856_v63, 0.0 }
 0x205   : > { %v953_v6 = vmax.f32 %v858_v2, 0.0 }
 0x206   : > { %v994_v7 = vpack.c.bf16 %v952_v4, %v950_v3 }
 0x207   : > { %v995_v9 = vpack.c.bf16 %v953_v6, %v951_v5  ;;  %v861_v0 = vpop.f32.mrb[44].mxu0 }
 0x208   : > { %v862_v11 = vadd.f32 %v861_v0, %v4078_v12  ;;  %v863_v14 = vpop.f32.mrb[45].mxu0 }
 0x209   : > { %v864_v15 = vadd.f32 %v863_v14, %v4081_v13  ;;  %v865_v16 = vpop.f32.mrb[46].mxu0  ;;  %1342 = vmatprep.mubr.bf16.mxu1 %v995_v9 }
 0x20a   : > { %v866_v17 = vadd.f32 %v865_v16, %v4078_v12  ;;  %v867_v18 = vpop.f32.mrb[47].mxu0  ;;  %1343 = vmatmul.mubr.bf16.gmra.mrb[40].mxu1 %v994_v7  ;;  %v954_v20 = vmax.f32 %v862_v11, 0.0 }
 0x20b   : > { %v868_v19 = vadd.f32 %v867_v18, %v4081_v13  ;;  %v955_v22 = vmax.f32 %v864_v15, 0.0 }
 0x20c   : > { %v956_v21 = vmax.f32 %v866_v17, 0.0 }
 0x20d   : > { %v957_v23 = vmax.f32 %v868_v19, 0.0 }
 0x20e   : > { %v996_v24 = vpack.c.bf16 %v956_v21, %v954_v20 }
 0x20f   : > { %v997_v25 = vpack.c.bf16 %v957_v23, %v955_v22  ;;  %v871_v26 = vpop.f32.mrb[48].mxu0 }
 0x210   : > { %v872_v27 = vadd.f32 %v871_v26, %v4078_v12  ;;  %v873_v28 = vpop.f32.mrb[49].mxu0  ;;  %v3357_v26 = vld [vmem:[#allocation10 + $0x48] sm:$0xff]  }
 0x211   : > { %v874_v29 = vadd.f32 %v873_v28, %v4081_v13  ;;  %v875_v30 = vpop.f32.mrb[50].mxu0  ;;  %1352 = vmatprep.mubr.bf16.mxu1 %v997_v25  ;;  %v3356_v25 = vld [vmem:[#allocation10] sm:$0xff]  }
 0x212   : > { %v876_v31 = vadd.f32 %v875_v30, %v4078_v12  ;;  %v877_v32 = vpop.f32.mrb[51].mxu0  ;;  %1353 = vmatmul.mubr.bf16.gmra.mrb[44].mxu1 %v996_v24  ;;  %v958_v36 = vmax.f32 %v872_v27, 0.0  ;;  %v3355_v24 = vld [vmem:[#allocation10 + $0x40] sm:$0xff]   ;;  %v3358_v27 = vld [vmem:[#allocation10 + $0x8] sm:$0xff]  }
 0x213   : > { %v878_v34 = vadd.f32 %v877_v32, %v4081_v13  ;;  %v959_v38 = vmax.f32 %v874_v29, 0.0  ;;  %2915 = vmatprep.subr.bf16.mxu1 %v3355_v24 }
 0x214   : > { %v960_v37 = vmax.f32 %v876_v31, 0.0  ;;  %2916 = vmatpush3.bf16.msra.mxu1 %v3356_v25 }
 0x215   : > { %v961_v39 = vmax.f32 %v878_v34, 0.0  ;;  %2917 = vmatprep.subr.bf16.mxu1 %v3357_v26 }
 0x216   : > { %v998_v40 = vpack.c.bf16 %v960_v37, %v958_v36  ;;  %v3359_v36 = vld [vmem:[#allocation10 + $0x50] sm:$0xff]  }
 0x217   : > { %v999_v41 = vpack.c.bf16 %v961_v39, %v959_v38  ;;  %v881_v42 = vpop.f32.mrb[52].mxu0  ;;  %v3360_v37 = vld [vmem:[#allocation10 + $0x10] sm:$0xff]   ;;  %v3361_v38 = vld [vmem:[#allocation10 + $0x58] sm:$0xff]  }
 0x218   : > { %v882_v43 = vadd.f32 %v881_v42, %v4078_v12  ;;  %v883_v44 = vpop.f32.mrb[53].mxu0  ;;  %2918 = vmatpush3.bf16.msra.mxu1 %v3358_v27 }
 0x219   : > { %v884_v45 = vadd.f32 %v883_v44, %v4081_v13  ;;  %v885_v46 = vpop.f32.mrb[54].mxu0  ;;  %1362 = vmatprep.mubr.bf16.mxu1 %v999_v41  ;;  %2919 = vmatprep.subr.bf16.mxu1 %v3359_v36  ;;  %v3362_v44 = vld [vmem:[#allocation10 + $0x18] sm:$0xff]  }
 0x21a   : > { %v886_v47 = vadd.f32 %v885_v46, %v4078_v12  ;;  %v887_v48 = vpop.f32.mrb[55].mxu0  ;;  %1363 = vmatmul.mubr.bf16.gmra.mrb[48].mxu1 %v998_v40  ;;  %v962_v50 = vmax.f32 %v882_v43, 0.0  ;;  %v3363_v46 = vld [vmem:[#allocation10 + $0x60] sm:$0xff]  }
 0x21b   : > { %v888_v49 = vadd.f32 %v887_v48, %v4081_v13  ;;  %v963_v52 = vmax.f32 %v884_v45, 0.0 }
 0x21c   : > { %v964_v51 = vmax.f32 %v886_v47, 0.0  ;;  %2920 = vmatpush3.bf16.msra.mxu1 %v3360_v37 }
 0x21d   : > { %v965_v53 = vmax.f32 %v888_v49, 0.0  ;;  %2921 = vmatprep.subr.bf16.mxu1 %v3361_v38 }
 0x21e   : > { %v1000_v54 = vpack.c.bf16 %v964_v51, %v962_v50 }
 0x21f   : > { %v1001_v55 = vpack.c.bf16 %v965_v53, %v963_v52  ;;  %v891_v56 = vpop.f32.mrb[56].mxu0  ;;  %v3364_v53 = vld [vmem:[#allocation10 + $0x20] sm:$0xff]  }
 0x220   : > { %v892_v57 = vadd.f32 %v891_v56, %v4078_v12  ;;  %v893_v58 = vpop.f32.mrb[57].mxu0  ;;  %2922 = vmatpush3.bf16.msra.mxu1 %v3362_v44  ;;  %v3365_v56 = vld [vmem:[#allocation10 + $0x68] sm:$0xff]  }
 0x221   : > { %v894_v59 = vadd.f32 %v893_v58, %v4081_v13  ;;  %v895_v60 = vpop.f32.mrb[58].mxu0  ;;  %1372 = vmatprep.mubr.bf16.mxu1 %v1001_v55  ;;  %2923 = vmatprep.subr.bf16.mxu1 %v3363_v46 }
 0x222   : > { %v896_v61 = vadd.f32 %v895_v60, %v4078_v12  ;;  %v897_v62 = vpop.f32.mrb[59].mxu0  ;;  %1373 = vmatmul.mubr.bf16.gmra.mrb[52].mxu1 %v1000_v54  ;;  %v966_v1 = vmax.f32 %v892_v57, 0.0 }
 0x223   : > { %v898_v63 = vadd.f32 %v897_v62, %v4081_v13  ;;  %v967_v3 = vmax.f32 %v894_v59, 0.0  ;;  %v3366_v62 = vld [vmem:[#allocation10 + $0x28] sm:$0xff]  }
 0x224   : > { %v968_v2 = vmax.f32 %v896_v61, 0.0  ;;  %2924 = vmatpush3.bf16.msra.mxu1 %v3364_v53 }
 0x225   : > { %v969_v4 = vmax.f32 %v898_v63, 0.0  ;;  %2925 = vmatprep.subr.bf16.mxu1 %v3365_v56 }
 0x226   : > { %v1002_v5 = vpack.c.bf16 %v968_v2, %v966_v1  ;;  %v3367_v1 = vld [vmem:[#allocation10 + $0x70] sm:$0xff]  }
 0x227   : > { %v1003_v6 = vpack.c.bf16 %v969_v4, %v967_v3  ;;  %v901_v7 = vpop.f32.mrb[60].mxu0 }
 0x228   : > { %v902_v9 = vadd.f32 %v901_v7, %v4078_v12  ;;  %v903_v0 = vpop.f32.mrb[61].mxu0  ;;  %2926 = vmatpush3.bf16.msra.mxu1 %v3366_v62 }
 0x229   : > { %v904_v11 = vadd.f32 %v903_v0, %v4081_v13  ;;  %v905_v14 = vpop.f32.mrb[62].mxu0  ;;  %1382 = vmatprep.mubr.bf16.mxu1 %v1003_v6  ;;  %2927 = vmatprep.subr.bf16.mxu1 %v3367_v1 }
 0x22a   : > { %v906_v15 = vadd.f32 %v905_v14, %v4078_v12  ;;  %v907_v16 = vpop.f32.mrb[63].mxu0  ;;  %1383 = vmatmul.mubr.bf16.gmra.mrb[56].mxu1 %v1002_v5  ;;  %v970_v18 = vmax.f32 %v902_v9, 0.0  ;;  %v1038_v12 = vld [vmem:[%s4457_s4] sm:$0x3]  ;;  %v3368_v9 = vld [vmem:[#allocation10 + $0x30] sm:$0xff]   ;;  %v3369_v14 = vld [vmem:[#allocation10 + $0x78] sm:$0xff]  }
 0x22b   : > { %v908_v17 = vadd.f32 %v907_v16, %v4081_v13  ;;  %v971_v20 = vmax.f32 %v904_v11, 0.0  ;;  %v4151_v13 = vrot.slane %v1038_v12, %v4070_v8  ;;  %v4154_v28 = vrot.slane %v1038_v12, %v4075_v10 }
 0x22c   : > { %v972_v19 = vmax.f32 %v906_v15, 0.0  ;;  %2928 = vmatpush3.bf16.msra.mxu1 %v3368_v9 }
 0x22d   : > { %v973_v21 = vmax.f32 %v908_v17, 0.0  ;;  %2929 = vmatprep.subr.bf16.mxu1 %v3369_v14 }
 0x22e   : > { %v1004_v22 = vpack.c.bf16 %v972_v19, %v970_v18 }
 0x22f   : > { %v1005_v23 = vpack.c.bf16 %v973_v21, %v971_v20  ;;  %v3370_v20 = vld [vmem:[#allocation10 + $0x38] sm:$0xff]  }
 0x230   : > { %2930 = vmatpush3.bf16.msra.mxu1 %v3370_v20 }
 0x231   : > { %1392 = vmatprep.mubr.bf16.mxu1 %v1005_v23 }
 0x232   : > { %1393 = vmatmul.mubr.bf16.gmra.mrb[60].mxu1 %v1004_v22 }
 0x28d   : > { %v1244_v29 = vpop.f32.mrb[0].mxu1 }
 0x28e   : > { %v1245_v30 = vadd.f32 %v1244_v29, %v4151_v13  ;;  %v1246_v31 = vpop.f32.mrb[1].mxu1 }
 0x28f   : > { %v1247_v32 = vadd.f32 %v1246_v31, %v4154_v28  ;;  %v1248_v33 = vpop.f32.mrb[2].mxu1 }
 0x290   : > { %v1249_v34 = vadd.f32 %v1248_v33, %v4151_v13  ;;  %v1250_v35 = vpop.f32.mrb[3].mxu1  ;;  %v1403_v40 = vmax.f32 %v1245_v30, 0.0 }
 0x291   : > { %v1251_v39 = vadd.f32 %v1250_v35, %v4154_v28  ;;  %v1404_v42 = vmax.f32 %v1247_v32, 0.0 }
 0x292   : > { %v1405_v41 = vmax.f32 %v1249_v34, 0.0 }
 0x293   : > { %v1406_v43 = vmax.f32 %v1251_v39, 0.0 }
 0x294   : > { %v1467_v45 = vpack.c.bf16 %v1405_v41, %v1403_v40 }
 0x295   : > { %v1468_v47 = vpack.c.bf16 %v1406_v43, %v1404_v42  ;;  %v1254_v48 = vpop.f32.mrb[4].mxu1 }
 0x296   : > { %v1255_v49 = vadd.f32 %v1254_v48, %v4151_v13  ;;  %v1256_v50 = vpop.f32.mrb[5].mxu1 }
 0x297   : > { %v1257_v51 = vadd.f32 %v1256_v50, %v4154_v28  ;;  %v1258_v52 = vpop.f32.mrb[6].mxu1  ;;  %1735 = vmatprep.mubr.bf16.mxu0 %v1468_v47 }
 0x298   : > { %v1259_v54 = vadd.f32 %v1258_v52, %v4151_v13  ;;  %v1260_v55 = vpop.f32.mrb[7].mxu1  ;;  %1736 = vmatmul.mubr.bf16.vlgmr.msra.gmra.mrb[64].mxu0 %v1467_v45  ;;  %v1407_v58 = vmax.f32 %v1255_v49, 0.0 }
 0x299   : > { %v1261_v57 = vadd.f32 %v1260_v55, %v4154_v28  ;;  %v1408_v60 = vmax.f32 %v1257_v51, 0.0 }
 0x29a   : > { %v1409_v59 = vmax.f32 %v1259_v54, 0.0 }
 0x29b   : > { %v1410_v61 = vmax.f32 %v1261_v57, 0.0 }
 0x29c   : > { %v1469_v63 = vpack.c.bf16 %v1409_v59, %v1407_v58 }
 0x29d   : > { %v1470_v2 = vpack.c.bf16 %v1410_v61, %v1408_v60  ;;  %v1264_v3 = vpop.f32.mrb[8].mxu1 }
 0x29e   : > { %v1265_v4 = vadd.f32 %v1264_v3, %v4151_v13  ;;  %v1266_v5 = vpop.f32.mrb[9].mxu1 }
 0x29f   : > { %v1267_v6 = vadd.f32 %v1266_v5, %v4154_v28  ;;  %v1268_v7 = vpop.f32.mrb[10].mxu1  ;;  %1745 = vmatprep.mubr.bf16.mxu0 %v1470_v2 }
 0x2a0   : > { %v1269_v0 = vadd.f32 %v1268_v7, %v4151_v13  ;;  %v1270_v11 = vpop.f32.mrb[11].mxu1  ;;  %1746 = vmatmul.mubr.bf16.gmra.mrb[68].mxu0 %v1469_v63  ;;  %v1411_v16 = vmax.f32 %v1265_v4, 0.0 }
 0x2a1   : > { %v1271_v15 = vadd.f32 %v1270_v11, %v4154_v28  ;;  %v1412_v18 = vmax.f32 %v1267_v6, 0.0 }
 0x2a2   : > { %v1413_v17 = vmax.f32 %v1269_v0, 0.0 }
 0x2a3   : > { %v1414_v19 = vmax.f32 %v1271_v15, 0.0 }
 0x2a4   : > { %v1471_v21 = vpack.c.bf16 %v1413_v17, %v1411_v16 }
 0x2a5   : > { %v1472_v22 = vpack.c.bf16 %v1414_v19, %v1412_v18  ;;  %v1274_v23 = vpop.f32.mrb[12].mxu1 }
 0x2a6   : > { %v1275_v24 = vadd.f32 %v1274_v23, %v4151_v13  ;;  %v1276_v25 = vpop.f32.mrb[13].mxu1 }
 0x2a7   : > { %v1277_v12 = vadd.f32 %v1276_v25, %v4154_v28  ;;  %v1278_v26 = vpop.f32.mrb[14].mxu1  ;;  %1755 = vmatprep.mubr.bf16.mxu0 %v1472_v22 }
 0x2a8   : > { %v1279_v27 = vadd.f32 %v1278_v26, %v4151_v13  ;;  %v1280_v29 = vpop.f32.mrb[15].mxu1  ;;  %1756 = vmatmul.mubr.bf16.gmra.mrb[72].mxu0 %v1471_v21  ;;  %v1415_v31 = vmax.f32 %v1275_v24, 0.0 }
 0x2a9   : > { %v1281_v30 = vadd.f32 %v1280_v29, %v4154_v28  ;;  %v1416_v33 = vmax.f32 %v1277_v12, 0.0 }
 0x2aa   : > { %v1417_v32 = vmax.f32 %v1279_v27, 0.0 }
 0x2ab   : > { %v1418_v34 = vmax.f32 %v1281_v30, 0.0 }
 0x2ac   : > { %v1473_v35 = vpack.c.bf16 %v1417_v32, %v1415_v31 }
 0x2ad   : > { %v1474_v36 = vpack.c.bf16 %v1418_v34, %v1416_v33  ;;  %v1284_v37 = vpop.f32.mrb[16].mxu1 }
 0x2ae   : > { %v1285_v38 = vadd.f32 %v1284_v37, %v4151_v13  ;;  %v1286_v39 = vpop.f32.mrb[17].mxu1 }
 0x2af   : > { %v1287_v40 = vadd.f32 %v1286_v39, %v4154_v28  ;;  %v1288_v41 = vpop.f32.mrb[18].mxu1  ;;  %1765 = vmatprep.mubr.bf16.mxu0 %v1474_v36 }
 0x2b0   : > { %v1289_v42 = vadd.f32 %v1288_v41, %v4151_v13  ;;  %v1290_v43 = vpop.f32.mrb[19].mxu1  ;;  %1766 = vmatmul.mubr.bf16.gmra.mrb[76].mxu0 %v1473_v35  ;;  %v1419_v45 = vmax.f32 %v1285_v38, 0.0 }
 0x2b1   : > { %v1291_v44 = vadd.f32 %v1290_v43, %v4154_v28  ;;  %v1420_v47 = vmax.f32 %v1287_v40, 0.0 }
 0x2b2   : > { %v1421_v46 = vmax.f32 %v1289_v42, 0.0 }
 0x2b3   : > { %v1422_v48 = vmax.f32 %v1291_v44, 0.0 }
 0x2b4   : > { %v1475_v49 = vpack.c.bf16 %v1421_v46, %v1419_v45 }
 0x2b5   : > { %v1476_v50 = vpack.c.bf16 %v1422_v48, %v1420_v47  ;;  %v1294_v51 = vpop.f32.mrb[20].mxu1 }
 0x2b6   : > { %v1295_v52 = vadd.f32 %v1294_v51, %v4151_v13  ;;  %v1296_v53 = vpop.f32.mrb[21].mxu1 }
 0x2b7   : > { %v1297_v54 = vadd.f32 %v1296_v53, %v4154_v28  ;;  %v1298_v55 = vpop.f32.mrb[22].mxu1  ;;  %1775 = vmatprep.mubr.bf16.mxu0 %v1476_v50 }
 0x2b8   : > { %v1299_v56 = vadd.f32 %v1298_v55, %v4151_v13  ;;  %v1300_v57 = vpop.f32.mrb[23].mxu1  ;;  %1776 = vmatmul.mubr.bf16.gmra.mrb[80].mxu0 %v1475_v49  ;;  %v1423_v59 = vmax.f32 %v1295_v52, 0.0 }
 0x2b9   : > { %v1301_v58 = vadd.f32 %v1300_v57, %v4154_v28  ;;  %v1424_v61 = vmax.f32 %v1297_v54, 0.0 }
 0x2ba   : > { %v1425_v60 = vmax.f32 %v1299_v56, 0.0 }
 0x2bb   : > { %v1426_v62 = vmax.f32 %v1301_v58, 0.0 }
 0x2bc   : > { %v1477_v63 = vpack.c.bf16 %v1425_v60, %v1423_v59 }
 0x2bd   : > { %v1478_v1 = vpack.c.bf16 %v1426_v62, %v1424_v61  ;;  %v1304_v2 = vpop.f32.mrb[24].mxu1 }
 0x2be   : > { %v1305_v3 = vadd.f32 %v1304_v2, %v4151_v13  ;;  %v1306_v4 = vpop.f32.mrb[25].mxu1 }
 0x2bf   : > { %v1307_v5 = vadd.f32 %v1306_v4, %v4154_v28  ;;  %v1308_v6 = vpop.f32.mrb[26].mxu1  ;;  %1785 = vmatprep.mubr.bf16.mxu0 %v1478_v1 }
 0x2c0   : > { %v1309_v7 = vadd.f32 %v1308_v6, %v4151_v13  ;;  %v1310_v9 = vpop.f32.mrb[27].mxu1  ;;  %1786 = vmatmul.mubr.bf16.gmra.mrb[84].mxu0 %v1477_v63  ;;  %v1427_v11 = vmax.f32 %v1305_v3, 0.0 }
 0x2c1   : > { %v1311_v0 = vadd.f32 %v1310_v9, %v4154_v28  ;;  %v1428_v15 = vmax.f32 %v1307_v5, 0.0 }
 0x2c2   : > { %v1429_v14 = vmax.f32 %v1309_v7, 0.0 }
 0x2c3   : > { %v1430_v16 = vmax.f32 %v1311_v0, 0.0 }
 0x2c4   : > { %v1479_v17 = vpack.c.bf16 %v1429_v14, %v1427_v11 }
 0x2c5   : > { %v1480_v18 = vpack.c.bf16 %v1430_v16, %v1428_v15  ;;  %v1314_v19 = vpop.f32.mrb[28].mxu1 }
 0x2c6   : > { %v1315_v20 = vadd.f32 %v1314_v19, %v4151_v13  ;;  %v1316_v21 = vpop.f32.mrb[29].mxu1 }
 0x2c7   : > { %v1317_v22 = vadd.f32 %v1316_v21, %v4154_v28  ;;  %v1318_v23 = vpop.f32.mrb[30].mxu1  ;;  %1795 = vmatprep.mubr.bf16.mxu0 %v1480_v18 }
 0x2c8   : > { %v1319_v24 = vadd.f32 %v1318_v23, %v4151_v13  ;;  %v1320_v25 = vpop.f32.mrb[31].mxu1  ;;  %1796 = vmatmul.mubr.bf16.gmra.mrb[88].mxu0 %v1479_v17  ;;  %v1431_v26 = vmax.f32 %v1315_v20, 0.0 }
 0x2c9   : > { %v1321_v12 = vadd.f32 %v1320_v25, %v4154_v28  ;;  %v1432_v29 = vmax.f32 %v1317_v22, 0.0 }
 0x2ca   : > { %v1433_v27 = vmax.f32 %v1319_v24, 0.0 }
 0x2cb   : > { %v1434_v30 = vmax.f32 %v1321_v12, 0.0 }
 0x2cc   : > { %v1481_v31 = vpack.c.bf16 %v1433_v27, %v1431_v26 }
 0x2cd   : > { %v1482_v32 = vpack.c.bf16 %v1434_v30, %v1432_v29  ;;  %v1324_v33 = vpop.f32.mrb[32].mxu1 }
 0x2ce   : > { %v1325_v34 = vadd.f32 %v1324_v33, %v4151_v13  ;;  %v1326_v35 = vpop.f32.mrb[33].mxu1 }
 0x2cf   : > { %v1327_v36 = vadd.f32 %v1326_v35, %v4154_v28  ;;  %v1328_v37 = vpop.f32.mrb[34].mxu1  ;;  %1805 = vmatprep.mubr.bf16.mxu0 %v1482_v32 }
 0x2d0   : > { %v1329_v38 = vadd.f32 %v1328_v37, %v4151_v13  ;;  %v1330_v39 = vpop.f32.mrb[35].mxu1  ;;  %1806 = vmatmul.mubr.bf16.gmra.mrb[92].mxu0 %v1481_v31  ;;  %v1435_v41 = vmax.f32 %v1325_v34, 0.0 }
 0x2d1   : > { %v1331_v40 = vadd.f32 %v1330_v39, %v4154_v28  ;;  %v1436_v43 = vmax.f32 %v1327_v36, 0.0 }
 0x2d2   : > { %v1437_v42 = vmax.f32 %v1329_v38, 0.0 }
 0x2d3   : > { %v1438_v44 = vmax.f32 %v1331_v40, 0.0 }
 0x2d4   : > { %v1483_v45 = vpack.c.bf16 %v1437_v42, %v1435_v41 }
 0x2d5   : > { %v1484_v46 = vpack.c.bf16 %v1438_v44, %v1436_v43  ;;  %v1334_v47 = vpop.f32.mrb[36].mxu1 }
 0x2d6   : > { %v1335_v48 = vadd.f32 %v1334_v47, %v4151_v13  ;;  %v1336_v49 = vpop.f32.mrb[37].mxu1 }
 0x2d7   : > { %v1337_v50 = vadd.f32 %v1336_v49, %v4154_v28  ;;  %v1338_v51 = vpop.f32.mrb[38].mxu1  ;;  %1815 = vmatprep.mubr.bf16.mxu0 %v1484_v46 }
 0x2d8   : > { %v1339_v52 = vadd.f32 %v1338_v51, %v4151_v13  ;;  %v1340_v53 = vpop.f32.mrb[39].mxu1  ;;  %1816 = vmatmul.mubr.bf16.gmra.mrb[96].mxu0 %v1483_v45  ;;  %v1439_v55 = vmax.f32 %v1335_v48, 0.0 }
 0x2d9   : > { %v1341_v54 = vadd.f32 %v1340_v53, %v4154_v28  ;;  %v1440_v57 = vmax.f32 %v1337_v50, 0.0 }
 0x2da   : > { %v1441_v56 = vmax.f32 %v1339_v52, 0.0 }
 0x2db   : > { %v1442_v58 = vmax.f32 %v1341_v54, 0.0 }
 0x2dc   : > { %v1485_v59 = vpack.c.bf16 %v1441_v56, %v1439_v55 }
 0x2dd   : > { %v1486_v60 = vpack.c.bf16 %v1442_v58, %v1440_v57  ;;  %v1344_v61 = vpop.f32.mrb[40].mxu1 }
 0x2de   : > { %v1345_v62 = vadd.f32 %v1344_v61, %v4151_v13  ;;  %v1346_v63 = vpop.f32.mrb[41].mxu1 }
 0x2df   : > { %v1347_v1 = vadd.f32 %v1346_v63, %v4154_v28  ;;  %v1348_v2 = vpop.f32.mrb[42].mxu1  ;;  %1825 = vmatprep.mubr.bf16.mxu0 %v1486_v60 }
 0x2e0   : > { %v1349_v3 = vadd.f32 %v1348_v2, %v4151_v13  ;;  %v1350_v4 = vpop.f32.mrb[43].mxu1  ;;  %1826 = vmatmul.mubr.bf16.gmra.mrb[100].mxu0 %v1485_v59  ;;  %v1443_v6 = vmax.f32 %v1345_v62, 0.0 }
 0x2e1   : > { %v1351_v5 = vadd.f32 %v1350_v4, %v4154_v28  ;;  %v1444_v9 = vmax.f32 %v1347_v1, 0.0 }
 0x2e2   : > { %v1445_v7 = vmax.f32 %v1349_v3, 0.0 }
 0x2e3   : > { %v1446_v0 = vmax.f32 %v1351_v5, 0.0 }
 0x2e4   : > { %v1487_v11 = vpack.c.bf16 %v1445_v7, %v1443_v6 }
 0x2e5   : > { %v1488_v14 = vpack.c.bf16 %v1446_v0, %v1444_v9  ;;  %v1354_v15 = vpop.f32.mrb[44].mxu1 }
 0x2e6   : > { %v1355_v16 = vadd.f32 %v1354_v15, %v4151_v13  ;;  %v1356_v17 = vpop.f32.mrb[45].mxu1 }
 0x2e7   : > { %v1357_v18 = vadd.f32 %v1356_v17, %v4154_v28  ;;  %v1358_v19 = vpop.f32.mrb[46].mxu1  ;;  %1835 = vmatprep.mubr.bf16.mxu0 %v1488_v14 }
 0x2e8   : > { %v1359_v20 = vadd.f32 %v1358_v19, %v4151_v13  ;;  %v1360_v21 = vpop.f32.mrb[47].mxu1  ;;  %1836 = vmatmul.mubr.bf16.gmra.mrb[104].mxu0 %v1487_v11  ;;  %v1447_v23 = vmax.f32 %v1355_v16, 0.0 }
 0x2e9   : > { %v1361_v22 = vadd.f32 %v1360_v21, %v4154_v28  ;;  %v1448_v25 = vmax.f32 %v1357_v18, 0.0 }
 0x2ea   : > { %v1449_v24 = vmax.f32 %v1359_v20, 0.0 }
 0x2eb   : > { %v1450_v12 = vmax.f32 %v1361_v22, 0.0 }
 0x2ec   : > { %v1489_v26 = vpack.c.bf16 %v1449_v24, %v1447_v23 }
 0x2ed   : > { %v1490_v27 = vpack.c.bf16 %v1450_v12, %v1448_v25  ;;  %v1364_v29 = vpop.f32.mrb[48].mxu1  ;;  %v1531_v25 = vld [vmem:[%s4459_s6] sm:$0x3] }
 0x2ee   : > { %v1365_v30 = vadd.f32 %v1364_v29, %v4151_v13  ;;  %v1366_v31 = vpop.f32.mrb[49].mxu1  ;;  %v4224_v12 = vrot.slane %v1531_v25, %v4070_v8 }
 0x2ef   : > { %v1367_v32 = vadd.f32 %v1366_v31, %v4154_v28  ;;  %v1368_v33 = vpop.f32.mrb[50].mxu1  ;;  %1845 = vmatprep.mubr.bf16.mxu0 %v1490_v27 }
 0x2f0   : > { %v1369_v34 = vadd.f32 %v1368_v33, %v4151_v13  ;;  %v1370_v35 = vpop.f32.mrb[51].mxu1  ;;  %1846 = vmatmul.mubr.bf16.gmra.mrb[108].mxu0 %v1489_v26  ;;  %v1451_v37 = vmax.f32 %v1365_v30, 0.0  ;;  %v3371_v33 = vld [vmem:[#allocation11] sm:$0xff]  }
 0x2f1   : > { %v1371_v36 = vadd.f32 %v1370_v35, %v4154_v28  ;;  %v1452_v39 = vmax.f32 %v1367_v32, 0.0  ;;  %3051 = vmatprep.subr.bf16.mxu0 %v3371_v33  ;;  %3099 = vmatprep.subr.bf16.mxu1 %v3371_v33 }
 0x2f2   : > { %v1453_v38 = vmax.f32 %v1369_v34, 0.0  ;;  %v3372_v34 = vld [vmem:[#allocation11 + $0x8] sm:$0xff]   ;;  %3052 = vmatpush3.bf16.msra.mxu0 %v3371_v33 }
 0x2f3   : > { %v1454_v40 = vmax.f32 %v1371_v36, 0.0  ;;  %3053 = vmatprep.subr.bf16.mxu0 %v3372_v34 }
 0x2f4   : > { %v1491_v41 = vpack.c.bf16 %v1453_v38, %v1451_v37 }
 0x2f5   : > { %v1492_v42 = vpack.c.bf16 %v1454_v40, %v1452_v39  ;;  %v1374_v43 = vpop.f32.mrb[52].mxu1  ;;  %v3373_v39 = vld [vmem:[#allocation11 + $0x10] sm:$0xff]  }
 0x2f6   : > { %v1375_v44 = vadd.f32 %v1374_v43, %v4151_v13  ;;  %v1376_v45 = vpop.f32.mrb[53].mxu1  ;;  %3054 = vmatpush3.bf16.msra.mxu0 %v3372_v34 }
 0x2f7   : > { %v1377_v46 = vadd.f32 %v1376_v45, %v4154_v28  ;;  %v1378_v47 = vpop.f32.mrb[54].mxu1  ;;  %1855 = vmatprep.mubr.bf16.mxu0 %v1492_v42  ;;  %3055 = vmatprep.subr.bf16.mxu0 %v3373_v39 }
 0x2f8   : > { %v1379_v48 = vadd.f32 %v1378_v47, %v4151_v13  ;;  %v1380_v49 = vpop.f32.mrb[55].mxu1  ;;  %1856 = vmatmul.mubr.bf16.gmra.mrb[112].mxu0 %v1491_v41  ;;  %v1455_v51 = vmax.f32 %v1375_v44, 0.0 }
 0x2f9   : > { %v1381_v50 = vadd.f32 %v1380_v49, %v4154_v28  ;;  %v1456_v53 = vmax.f32 %v1377_v46, 0.0 }
 0x2fa   : > { %v1457_v52 = vmax.f32 %v1379_v48, 0.0  ;;  %3056 = vmatpush3.bf16.msra.mxu0 %v3373_v39 }
 0x2fb   : > { %v1458_v54 = vmax.f32 %v1381_v50, 0.0 }
 0x2fc   : > { %v1493_v55 = vpack.c.bf16 %v1457_v52, %v1455_v51 }
 0x2fd   : > { %v1494_v56 = vpack.c.bf16 %v1458_v54, %v1456_v53  ;;  %v1384_v57 = vpop.f32.mrb[56].mxu1 }
 0x2fe   : > { %v1385_v58 = vadd.f32 %v1384_v57, %v4151_v13  ;;  %v1386_v59 = vpop.f32.mrb[57].mxu1 }
 0x2ff   : > { %v1387_v60 = vadd.f32 %v1386_v59, %v4154_v28  ;;  %v1388_v61 = vpop.f32.mrb[58].mxu1  ;;  %1865 = vmatprep.mubr.bf16.mxu0 %v1494_v56 }
 0x300   : > { %v1389_v62 = vadd.f32 %v1388_v61, %v4151_v13  ;;  %v1390_v63 = vpop.f32.mrb[59].mxu1  ;;  %1866 = vmatmul.mubr.bf16.gmra.mrb[116].mxu0 %v1493_v55  ;;  %v1459_v2 = vmax.f32 %v1385_v58, 0.0 }
 0x301   : > { %v1391_v1 = vadd.f32 %v1390_v63, %v4154_v28  ;;  %v1460_v4 = vmax.f32 %v1387_v60, 0.0 }
 0x302   : > { %v1461_v3 = vmax.f32 %v1389_v62, 0.0 }
 0x303   : > { %v1462_v5 = vmax.f32 %v1391_v1, 0.0 }
 0x304   : > { %v1495_v6 = vpack.c.bf16 %v1461_v3, %v1459_v2 }
 0x305   : > { %v1496_v7 = vpack.c.bf16 %v1462_v5, %v1460_v4  ;;  %v1394_v9 = vpop.f32.mrb[60].mxu1 }
 0x306   : > { %v1395_v0 = vadd.f32 %v1394_v9, %v4151_v13  ;;  %v1396_v11 = vpop.f32.mrb[61].mxu1 }
 0x307   : > { %v1397_v14 = vadd.f32 %v1396_v11, %v4154_v28  ;;  %v1398_v15 = vpop.f32.mrb[62].mxu1  ;;  %1875 = vmatprep.mubr.bf16.mxu0 %v1496_v7 }
 0x308   : > { %v1399_v16 = vadd.f32 %v1398_v15, %v4151_v13  ;;  %v1400_v17 = vpop.f32.mrb[63].mxu1  ;;  %1876 = vmatmul.mubr.bf16.gmra.mrb[120].mxu0 %v1495_v6  ;;  %v1463_v19 = vmax.f32 %v1395_v0, 0.0  ;;  %v4227_v13 = vrot.slane %v1531_v25, %v4075_v10 }
 0x309   : > { %v1401_v18 = vadd.f32 %v1400_v17, %v4154_v28  ;;  %v1464_v21 = vmax.f32 %v1397_v14, 0.0 }
 0x30a   : > { %v1465_v20 = vmax.f32 %v1399_v16, 0.0 }
 0x30b   : > { %v1466_v22 = vmax.f32 %v1401_v18, 0.0 }
 0x30c   : > { %v1497_v23 = vpack.c.bf16 %v1465_v20, %v1463_v19 }
 0x30d   : > { %v1498_v24 = vpack.c.bf16 %v1466_v22, %v1464_v21 }
 0x30f   : > { %1885 = vmatprep.mubr.bf16.mxu0 %v1498_v24 }
 0x310   : > { %1886 = vmatmul.mubr.bf16.gmra.mrb[124].mxu0 %v1497_v23 }
 0x36b   : > { %v1737_v26 = vpop.f32.mrb[64].mxu0 }
 0x36c   : > { %v1738_v28 = vadd.f32 %v1737_v26, %v4224_v12  ;;  %v1739_v27 = vpop.f32.mrb[65].mxu0 }
 0x36d   : > { %v1740_v29 = vadd.f32 %v1739_v27, %v4227_v13  ;;  %v1741_v30 = vpop.f32.mrb[66].mxu0 }
 0x36e   : > { %v1742_v31 = vadd.f32 %v1741_v30, %v4224_v12  ;;  %v1743_v32 = vpop.f32.mrb[67].mxu0  ;;  %v1896_v36 = vmax.f32 %v1738_v28, 0.0 }
 0x36f   : > { %v1744_v35 = vadd.f32 %v1743_v32, %v4227_v13  ;;  %v1897_v10 = vmax.f32 %v1740_v29, 0.0 }
 0x370   : > { %v1898_v8 = vmax.f32 %v1742_v31, 0.0 }
 0x371   : > { %v1899_v37 = vmax.f32 %v1744_v35, 0.0 }
 0x372   : > { %v1960_v38 = vpack.c.bf16 %v1898_v8, %v1896_v36 }
 0x373   : > { %v1961_v40 = vpack.c.bf16 %v1899_v37, %v1897_v10  ;;  %v1747_v41 = vpop.f32.mrb[68].mxu0 }
 0x374   : > { %v1748_v42 = vadd.f32 %v1747_v41, %v4224_v12  ;;  %v1749_v43 = vpop.f32.mrb[69].mxu0 }
 0x375   : > { %v1750_v44 = vadd.f32 %v1749_v43, %v4227_v13  ;;  %v1751_v45 = vpop.f32.mrb[70].mxu0  ;;  %2159 = vmatprep.mubr.bf16.mxu1 %v1961_v40 }
 0x376   : > { %v1752_v46 = vadd.f32 %v1751_v45, %v4224_v12  ;;  %v1753_v47 = vpop.f32.mrb[71].mxu0  ;;  %2160 = vmatmul.mubr.bf16.vlgmr.msra.gmra.mrb[64].mxu1 %v1960_v38  ;;  %v1900_v49 = vmax.f32 %v1748_v42, 0.0 }
 0x377   : > { %v1754_v48 = vadd.f32 %v1753_v47, %v4227_v13  ;;  %3107 = vmatpush3.bf16.msra.mxu1 %v3371_v33  ;;  %v1901_v51 = vmax.f32 %v1750_v44, 0.0 }
 0x378   : > { %v1902_v50 = vmax.f32 %v1752_v46, 0.0  ;;  %3100 = vmatprep.subr.bf16.mxu1 %v3372_v34 }
 0x379   : > { %v1903_v52 = vmax.f32 %v1754_v48, 0.0 }
 0x37a   : > { %v1962_v53 = vpack.c.bf16 %v1902_v50, %v1900_v49 }
 0x37b   : > { %v1963_v54 = vpack.c.bf16 %v1903_v52, %v1901_v51  ;;  %v1757_v55 = vpop.f32.mrb[72].mxu0  ;;  %3108 = vmatpush3.bf16.msra.mxu1 %v3372_v34 }
 0x37c   : > { %v1758_v56 = vadd.f32 %v1757_v55, %v4224_v12  ;;  %v1759_v57 = vpop.f32.mrb[73].mxu0  ;;  %3101 = vmatprep.subr.bf16.mxu1 %v3373_v39 }
 0x37d   : > { %v1760_v58 = vadd.f32 %v1759_v57, %v4227_v13  ;;  %v1761_v59 = vpop.f32.mrb[74].mxu0  ;;  %2167 = vmatprep.mubr.bf16.mxu1 %v1963_v54 }
 0x37e   : > { %v1762_v60 = vadd.f32 %v1761_v59, %v4224_v12  ;;  %v1763_v61 = vpop.f32.mrb[75].mxu0  ;;  %2168 = vmatmul.mubr.bf16.gmra.mrb[68].mxu1 %v1962_v53  ;;  %v1904_v63 = vmax.f32 %v1758_v56, 0.0 }
 0x37f   : > { %v1764_v62 = vadd.f32 %v1763_v61, %v4227_v13  ;;  %3109 = vmatpush3.bf16.msra.mxu1 %v3373_v39  ;;  %v1905_v2 = vmax.f32 %v1760_v58, 0.0 }
 0x380   : > { %v1906_v1 = vmax.f32 %v1762_v60, 0.0 }
 0x381   : > { %v1907_v3 = vmax.f32 %v1764_v62, 0.0 }
 0x382   : > { %v1964_v4 = vpack.c.bf16 %v1906_v1, %v1904_v63 }
 0x383   : > { %v1965_v5 = vpack.c.bf16 %v1907_v3, %v1905_v2  ;;  %v1767_v6 = vpop.f32.mrb[76].mxu0 }
 0x384   : > { %v1768_v7 = vadd.f32 %v1767_v6, %v4224_v12  ;;  %v1769_v9 = vpop.f32.mrb[77].mxu0 }
 0x385   : > { %v1770_v0 = vadd.f32 %v1769_v9, %v4227_v13  ;;  %v1771_v11 = vpop.f32.mrb[78].mxu0  ;;  %2175 = vmatprep.mubr.bf16.mxu1 %v1965_v5 }
 0x386   : > { %v1772_v14 = vadd.f32 %v1771_v11, %v4224_v12  ;;  %v1773_v15 = vpop.f32.mrb[79].mxu0  ;;  %2176 = vmatmul.mubr.bf16.gmra.mrb[72].mxu1 %v1964_v4  ;;  %v1908_v17 = vmax.f32 %v1768_v7, 0.0 }
 0x387   : > { %v1774_v16 = vadd.f32 %v1773_v15, %v4227_v13  ;;  %v1909_v19 = vmax.f32 %v1770_v0, 0.0 }
 0x388   : > { %v1910_v18 = vmax.f32 %v1772_v14, 0.0 }
 0x389   : > { %v1911_v20 = vmax.f32 %v1774_v16, 0.0 }
 0x38a   : > { %v1966_v21 = vpack.c.bf16 %v1910_v18, %v1908_v17 }
 0x38b   : > { %v1967_v22 = vpack.c.bf16 %v1911_v20, %v1909_v19  ;;  %v1777_v23 = vpop.f32.mrb[80].mxu0 }
 0x38c   : > { %v1778_v24 = vadd.f32 %v1777_v23, %v4224_v12  ;;  %v1779_v25 = vpop.f32.mrb[81].mxu0 }
 0x38d   : > { %v1780_v26 = vadd.f32 %v1779_v25, %v4227_v13  ;;  %v1781_v28 = vpop.f32.mrb[82].mxu0  ;;  %2183 = vmatprep.mubr.bf16.mxu1 %v1967_v22 }
 0x38e   : > { %v1782_v27 = vadd.f32 %v1781_v28, %v4224_v12  ;;  %v1783_v29 = vpop.f32.mrb[83].mxu0  ;;  %2184 = vmatmul.mubr.bf16.gmra.mrb[76].mxu1 %v1966_v21  ;;  %v1912_v31 = vmax.f32 %v1778_v24, 0.0 }
 0x38f   : > { %v1784_v30 = vadd.f32 %v1783_v29, %v4227_v13  ;;  %v1913_v33 = vmax.f32 %v1780_v26, 0.0 }
 0x390   : > { %v1914_v32 = vmax.f32 %v1782_v27, 0.0 }
 0x391   : > { %v1915_v34 = vmax.f32 %v1784_v30, 0.0 }
 0x392   : > { %v1968_v35 = vpack.c.bf16 %v1914_v32, %v1912_v31 }
 0x393   : > { %v1969_v36 = vpack.c.bf16 %v1915_v34, %v1913_v33  ;;  %v1787_v8 = vpop.f32.mrb[84].mxu0 }
 0x394   : > { %v1788_v10 = vadd.f32 %v1787_v8, %v4224_v12  ;;  %v1789_v37 = vpop.f32.mrb[85].mxu0 }
 0x395   : > { %v1790_v38 = vadd.f32 %v1789_v37, %v4227_v13  ;;  %v1791_v39 = vpop.f32.mrb[86].mxu0  ;;  %2191 = vmatprep.mubr.bf16.mxu1 %v1969_v36 }
 0x396   : > { %v1792_v40 = vadd.f32 %v1791_v39, %v4224_v12  ;;  %v1793_v41 = vpop.f32.mrb[87].mxu0  ;;  %2192 = vmatmul.mubr.bf16.gmra.mrb[80].mxu1 %v1968_v35  ;;  %v1916_v43 = vmax.f32 %v1788_v10, 0.0 }
 0x397   : > { %v1794_v42 = vadd.f32 %v1793_v41, %v4227_v13  ;;  %v1917_v45 = vmax.f32 %v1790_v38, 0.0 }
 0x398   : > { %v1918_v44 = vmax.f32 %v1792_v40, 0.0 }
 0x399   : > { %v1919_v46 = vmax.f32 %v1794_v42, 0.0 }
 0x39a   : > { %v1970_v47 = vpack.c.bf16 %v1918_v44, %v1916_v43 }
 0x39b   : > { %v1971_v48 = vpack.c.bf16 %v1919_v46, %v1917_v45  ;;  %v1797_v49 = vpop.f32.mrb[88].mxu0 }
 0x39c   : > { %v1798_v50 = vadd.f32 %v1797_v49, %v4224_v12  ;;  %v1799_v51 = vpop.f32.mrb[89].mxu0 }
 0x39d   : > { %v1800_v52 = vadd.f32 %v1799_v51, %v4227_v13  ;;  %v1801_v53 = vpop.f32.mrb[90].mxu0  ;;  %2199 = vmatprep.mubr.bf16.mxu1 %v1971_v48 }
 0x39e   : > { %v1802_v54 = vadd.f32 %v1801_v53, %v4224_v12  ;;  %v1803_v55 = vpop.f32.mrb[91].mxu0  ;;  %2200 = vmatmul.mubr.bf16.gmra.mrb[84].mxu1 %v1970_v47  ;;  %v1920_v57 = vmax.f32 %v1798_v50, 0.0 }
 0x39f   : > { %v1804_v56 = vadd.f32 %v1803_v55, %v4227_v13  ;;  %v1921_v59 = vmax.f32 %v1800_v52, 0.0 }
 0x3a0   : > { %v1922_v58 = vmax.f32 %v1802_v54, 0.0 }
 0x3a1   : > { %v1923_v60 = vmax.f32 %v1804_v56, 0.0 }
 0x3a2   : > { %v1972_v61 = vpack.c.bf16 %v1922_v58, %v1920_v57 }
 0x3a3   : > { %v1973_v62 = vpack.c.bf16 %v1923_v60, %v1921_v59  ;;  %v1807_v63 = vpop.f32.mrb[92].mxu0 }
 0x3a4   : > { %v1808_v1 = vadd.f32 %v1807_v63, %v4224_v12  ;;  %v1809_v2 = vpop.f32.mrb[93].mxu0 }
 0x3a5   : > { %v1810_v3 = vadd.f32 %v1809_v2, %v4227_v13  ;;  %v1811_v4 = vpop.f32.mrb[94].mxu0  ;;  %2207 = vmatprep.mubr.bf16.mxu1 %v1973_v62  ;;  %v3374_v2 = vld [vmem:[#allocation11 + $0x18] sm:$0xff]  }
 0x3a6   : > { %v1812_v5 = vadd.f32 %v1811_v4, %v4224_v12  ;;  %v1813_v6 = vpop.f32.mrb[95].mxu0  ;;  %2208 = vmatmul.mubr.bf16.gmra.mrb[88].mxu1 %v1972_v61  ;;  %v1924_v9 = vmax.f32 %v1808_v1, 0.0  ;;  %3057 = vmatprep.subr.bf16.mxu0 %v3374_v2 }
 0x3a7   : > { %v1814_v7 = vadd.f32 %v1813_v6, %v4227_v13  ;;  %v1925_v11 = vmax.f32 %v1810_v3, 0.0  ;;  %3102 = vmatprep.subr.bf16.mxu1 %v3374_v2  ;;  %3058 = vmatpush3.bf16.msra.mxu0 %v3374_v2 }
 0x3a8   : > { %v1926_v0 = vmax.f32 %v1812_v5, 0.0  ;;  %3110 = vmatpush3.bf16.msra.mxu1 %v3374_v2 }
 0x3a9   : > { %v1927_v14 = vmax.f32 %v1814_v7, 0.0 }
 0x3aa   : > { %v1974_v15 = vpack.c.bf16 %v1926_v0, %v1924_v9 }
 0x3ab   : > { %v1975_v16 = vpack.c.bf16 %v1927_v14, %v1925_v11  ;;  %v1817_v17 = vpop.f32.mrb[96].mxu0  ;;  %v3375_v11 = vld [vmem:[#allocation11 + $0x20] sm:$0xff]  }
 0x3ac   : > { %v1818_v18 = vadd.f32 %v1817_v17, %v4224_v12  ;;  %v1819_v19 = vpop.f32.mrb[97].mxu0  ;;  %3059 = vmatprep.subr.bf16.mxu0 %v3375_v11  ;;  %3103 = vmatprep.subr.bf16.mxu1 %v3375_v11 }
 0x3ad   : > { %v1820_v20 = vadd.f32 %v1819_v19, %v4227_v13  ;;  %v1821_v21 = vpop.f32.mrb[98].mxu0  ;;  %2215 = vmatprep.mubr.bf16.mxu1 %v1975_v16  ;;  %3060 = vmatpush3.bf16.msra.mxu0 %v3375_v11 }
 0x3ae   : > { %v1822_v22 = vadd.f32 %v1821_v21, %v4224_v12  ;;  %v1823_v23 = vpop.f32.mrb[99].mxu0  ;;  %2216 = vmatmul.mubr.bf16.gmra.mrb[92].mxu1 %v1974_v15  ;;  %v1928_v25 = vmax.f32 %v1818_v18, 0.0  ;;  %v3376_v21 = vld [vmem:[#allocation11 + $0x28] sm:$0xff]  }
 0x3af   : > { %v1824_v24 = vadd.f32 %v1823_v23, %v4227_v13  ;;  %v1929_v28 = vmax.f32 %v1820_v20, 0.0  ;;  %3111 = vmatpush3.bf16.msra.mxu1 %v3375_v11  ;;  %3061 = vmatprep.subr.bf16.mxu0 %v3376_v21 }
 0x3b0   : > { %v1930_v26 = vmax.f32 %v1822_v22, 0.0  ;;  %3104 = vmatprep.subr.bf16.mxu1 %v3376_v21 }
 0x3b1   : > { %v1931_v27 = vmax.f32 %v1824_v24, 0.0  ;;  %3062 = vmatpush3.bf16.msra.mxu0 %v3376_v21 }
 0x3b2   : > { %v1976_v29 = vpack.c.bf16 %v1930_v26, %v1928_v25 }
 0x3b3   : > { %v1977_v30 = vpack.c.bf16 %v1931_v27, %v1929_v28  ;;  %v1827_v31 = vpop.f32.mrb[100].mxu0  ;;  %3112 = vmatpush3.bf16.msra.mxu1 %v3376_v21 }
 0x3b4   : > { %v1828_v32 = vadd.f32 %v1827_v31, %v4224_v12  ;;  %v1829_v33 = vpop.f32.mrb[101].mxu0 }
 0x3b5   : > { %v1830_v34 = vadd.f32 %v1829_v33, %v4227_v13  ;;  %v1831_v35 = vpop.f32.mrb[102].mxu0  ;;  %2223 = vmatprep.mubr.bf16.mxu1 %v1977_v30 }
 0x3b6   : > { %v1832_v36 = vadd.f32 %v1831_v35, %v4224_v12  ;;  %v1833_v8 = vpop.f32.mrb[103].mxu0  ;;  %2224 = vmatmul.mubr.bf16.gmra.mrb[96].mxu1 %v1976_v29  ;;  %v1932_v37 = vmax.f32 %v1828_v32, 0.0  ;;  %v3377_v29 = vld [vmem:[#allocation11 + $0x30] sm:$0xff]  }
 0x3b7   : > { %v1834_v10 = vadd.f32 %v1833_v8, %v4227_v13  ;;  %v1933_v39 = vmax.f32 %v1830_v34, 0.0  ;;  %3063 = vmatprep.subr.bf16.mxu0 %v3377_v29  ;;  %v3378_v8 = vld [vmem:[#allocation11 + $0x38] sm:$0xff]   ;;  %3105 = vmatprep.subr.bf16.mxu1 %v3377_v29 }
 0x3b8   : > { %v1934_v38 = vmax.f32 %v1832_v36, 0.0  ;;  %3064 = vmatpush3.bf16.msra.mxu0 %v3377_v29  ;;  %3113 = vmatpush3.bf16.msra.mxu1 %v3377_v29 }
 0x3b9   : > { %v1935_v40 = vmax.f32 %v1834_v10, 0.0  ;;  %3065 = vmatprep.subr.bf16.mxu0 %v3378_v8  ;;  %3106 = vmatprep.subr.bf16.mxu1 %v3378_v8 }
 0x3ba   : > { %v1978_v41 = vpack.c.bf16 %v1934_v38, %v1932_v37 }
 0x3bb   : > { %v1979_v42 = vpack.c.bf16 %v1935_v40, %v1933_v39  ;;  %v1837_v43 = vpop.f32.mrb[104].mxu0 }
 0x3bc   : > { %v1838_v44 = vadd.f32 %v1837_v43, %v4224_v12  ;;  %v1839_v45 = vpop.f32.mrb[105].mxu0  ;;  %3066 = vmatpush3.bf16.msra.mxu0 %v3378_v8  ;;  %3114 = vmatpush3.bf16.msra.mxu1 %v3378_v8 }
 0x3bd   : > { %v1840_v46 = vadd.f32 %v1839_v45, %v4227_v13  ;;  %v1841_v47 = vpop.f32.mrb[106].mxu0  ;;  %2231 = vmatprep.mubr.bf16.mxu1 %v1979_v42 }
 0x3be   : > { %v1842_v48 = vadd.f32 %v1841_v47, %v4224_v12  ;;  %v1843_v49 = vpop.f32.mrb[107].mxu0  ;;  %2232 = vmatmul.mubr.bf16.gmra.mrb[100].mxu1 %v1978_v41  ;;  %v1936_v51 = vmax.f32 %v1838_v44, 0.0 }
 0x3bf   : > { %v1844_v50 = vadd.f32 %v1843_v49, %v4227_v13  ;;  %v1937_v53 = vmax.f32 %v1840_v46, 0.0 }
 0x3c0   : > { %v1938_v52 = vmax.f32 %v1842_v48, 0.0 }
 0x3c1   : > { %v1939_v54 = vmax.f32 %v1844_v50, 0.0 }
 0x3c2   : > { %v1980_v55 = vpack.c.bf16 %v1938_v52, %v1936_v51 }
 0x3c3   : > { %v1981_v56 = vpack.c.bf16 %v1939_v54, %v1937_v53  ;;  %v1847_v57 = vpop.f32.mrb[108].mxu0 }
 0x3c4   : > { %v1848_v58 = vadd.f32 %v1847_v57, %v4224_v12  ;;  %v1849_v59 = vpop.f32.mrb[109].mxu0 }
 0x3c5   : > { %v1850_v60 = vadd.f32 %v1849_v59, %v4227_v13  ;;  %v1851_v61 = vpop.f32.mrb[110].mxu0  ;;  %2239 = vmatprep.mubr.bf16.mxu1 %v1981_v56 }
 0x3c6   : > { %v1852_v62 = vadd.f32 %v1851_v61, %v4224_v12  ;;  %v1853_v63 = vpop.f32.mrb[111].mxu0  ;;  %2240 = vmatmul.mubr.bf16.gmra.mrb[104].mxu1 %v1980_v55  ;;  %v1940_v3 = vmax.f32 %v1848_v58, 0.0 }
 0x3c7   : > { %v1854_v1 = vadd.f32 %v1853_v63, %v4227_v13  ;;  %v1941_v5 = vmax.f32 %v1850_v60, 0.0 }
 0x3c8   : > { %v1942_v4 = vmax.f32 %v1852_v62, 0.0 }
 0x3c9   : > { %v1943_v6 = vmax.f32 %v1854_v1, 0.0 }
 0x3ca   : > { %v1982_v7 = vpack.c.bf16 %v1942_v4, %v1940_v3 }
 0x3cb   : > { %v1983_v9 = vpack.c.bf16 %v1943_v6, %v1941_v5  ;;  %v1857_v0 = vpop.f32.mrb[112].mxu0 }
 0x3cc   : > { %v1858_v14 = vadd.f32 %v1857_v0, %v4224_v12  ;;  %v1859_v15 = vpop.f32.mrb[113].mxu0 }
 0x3cd   : > { %v1860_v16 = vadd.f32 %v1859_v15, %v4227_v13  ;;  %v1861_v17 = vpop.f32.mrb[114].mxu0  ;;  %2247 = vmatprep.mubr.bf16.mxu1 %v1983_v9  ;;  %v4296_v9 = vld [vmem:[%s4491_s11] ss:$0 sm:$0xff]  ;;  %s3613_s11 = scalar_lea.vmem %s4406_s8, 4096 }
 0x3ce   : > { %v1862_v18 = vadd.f32 %v1861_v17, %v4224_v12  ;;  %v1863_v19 = vpop.f32.mrb[115].mxu0  ;;  %2248 = vmatmul.mubr.bf16.gmra.mrb[108].mxu1 %v1982_v7  ;;  %v1944_v22 = vmax.f32 %v1858_v14, 0.0  ;;  %p3614_p7 = scmp.ne.s32.totalorder %s4406_s8, %s3613_s11 }
 0x3cf   : > { %v1864_v20 = vadd.f32 %v1863_v19, %v4227_v13  ;;  %v1945_v24 = vmax.f32 %v1860_v16, 0.0 }
 0x3d0   : > { %v1946_v23 = vmax.f32 %v1862_v18, 0.0  ;;  %p3615_p12 = pnand %p3614_p7, %p4494_p4 }
 0x3d1   : > { %v1947_v25 = vmax.f32 %v1864_v20, 0.0 }
 0x3d2   : > { %v1984_v26 = vpack.c.bf16 %v1946_v23, %v1944_v22  ;;  %p3616_p1 = pneg %p3615_p12 }
 0x3d3   : > { %v1985_v28 = vpack.c.bf16 %v1947_v25, %v1945_v24  ;;  %v1867_v27 = vpop.f32.mrb[116].mxu0 }
 0x3d4   : > { %v1868_v30 = vadd.f32 %v1867_v27, %v4224_v12  ;;  %v1869_v31 = vpop.f32.mrb[117].mxu0 }
 0x3d5   : > { %v1870_v32 = vadd.f32 %v1869_v31, %v4227_v13  ;;  %v1871_v33 = vpop.f32.mrb[118].mxu0  ;;  %2255 = vmatprep.mubr.bf16.mxu1 %v1985_v28 }
 0x3d6   : > { %v1872_v34 = vadd.f32 %v1871_v33, %v4224_v12  ;;  %v1873_v35 = vpop.f32.mrb[119].mxu0  ;;  %2256 = vmatmul.mubr.bf16.gmra.mrb[112].mxu1 %v1984_v26  ;;  %v1948_v10 = vmax.f32 %v1868_v30, 0.0 }
 0x3d7   : > { %v1874_v36 = vadd.f32 %v1873_v35, %v4227_v13  ;;  %v1949_v38 = vmax.f32 %v1870_v32, 0.0 }
 0x3d8   : > { %v1950_v37 = vmax.f32 %v1872_v34, 0.0 }
 0x3d9   : > { %v1951_v39 = vmax.f32 %v1874_v36, 0.0 }
 0x3da   : > { %v1986_v40 = vpack.c.bf16 %v1950_v37, %v1948_v10 }
 0x3db   : > { %v1987_v41 = vpack.c.bf16 %v1951_v39, %v1949_v38  ;;  %v1877_v42 = vpop.f32.mrb[120].mxu0 }
 0x3dc   : > { %v1878_v43 = vadd.f32 %v1877_v42, %v4224_v12  ;;  %v1879_v44 = vpop.f32.mrb[121].mxu0 }
 0x3dd   : > { %v1880_v45 = vadd.f32 %v1879_v44, %v4227_v13  ;;  %v1881_v46 = vpop.f32.mrb[122].mxu0  ;;  %2263 = vmatprep.mubr.bf16.mxu1 %v1987_v41 }
 0x3de   : > { %v1882_v47 = vadd.f32 %v1881_v46, %v4224_v12  ;;  %v1883_v48 = vpop.f32.mrb[123].mxu0  ;;  %2264 = vmatmul.mubr.bf16.gmra.mrb[116].mxu1 %v1986_v40  ;;  %v1952_v50 = vmax.f32 %v1878_v43, 0.0 }
 0x3df   : > { %v1884_v49 = vadd.f32 %v1883_v48, %v4227_v13  ;;  %v1953_v52 = vmax.f32 %v1880_v45, 0.0 }
 0x3e0   : > { %v1954_v51 = vmax.f32 %v1882_v47, 0.0 }
 0x3e1   : > { %v1955_v53 = vmax.f32 %v1884_v49, 0.0 }
 0x3e2   : > { %v1988_v54 = vpack.c.bf16 %v1954_v51, %v1952_v50 }
 0x3e3   : > { %v1989_v55 = vpack.c.bf16 %v1955_v53, %v1953_v52  ;;  %v1887_v56 = vpop.f32.mrb[124].mxu0 }
 0x3e4   : > { %v1888_v57 = vadd.f32 %v1887_v56, %v4224_v12  ;;  %v1889_v58 = vpop.f32.mrb[125].mxu0 }
 0x3e5   : > { %v1890_v59 = vadd.f32 %v1889_v58, %v4227_v13  ;;  %v1891_v60 = vpop.f32.mrb[126].mxu0  ;;  %2271 = vmatprep.mubr.bf16.mxu1 %v1989_v55 }
 0x3e6   : > { %v1892_v61 = vadd.f32 %v1891_v60, %v4224_v12  ;;  %v1893_v62 = vpop.f32.mrb[127].mxu0  ;;  %2272 = vmatmul.mubr.bf16.gmra.mrb[120].mxu1 %v1988_v54  ;;  %v1956_v1 = vmax.f32 %v1888_v57, 0.0 }
 0x3e7   : > { %v1894_v63 = vadd.f32 %v1893_v62, %v4227_v13  ;;  %v1957_v3 = vmax.f32 %v1890_v59, 0.0 }
 0x3e8   : > { %v1958_v2 = vmax.f32 %v1892_v61, 0.0 }
 0x3e9   : > { %v1959_v4 = vmax.f32 %v1894_v63, 0.0 }
 0x3ea   : > { %v1990_v5 = vpack.c.bf16 %v1958_v2, %v1956_v1 }
 0x3eb   : > { %v1991_v6 = vpack.c.bf16 %v1959_v4, %v1957_v3 }
 0x3ed   : > { %2279 = vmatprep.mubr.bf16.mxu1 %v1991_v6 }
 0x3ee   : > { %2280 = vmatmul.mubr.bf16.gmra.mrb[124].mxu1 %v1990_v5 }
 0x449   : > { %v2931_v7 = vpop.f32.mrb[64].mxu1 }
 0x44a   : > { %v2932_v0 = vpop.f32.mrb[65].mxu1 }
 0x44b   : > { %v2933_v12 = vadd.f32 %v2932_v0, %v2931_v7  ;;  %v2934_v11 = vpop.f32.mrb[66].mxu1 }
 0x44c   : > { %v2935_v14 = vpop.f32.mrb[67].mxu1 }
 0x44d   : > { %v2162_v13 = vadd.f32 %v2933_v12, %v4296_v9  ;;  %v2936_v15 = vadd.f32 %v2935_v14, %v2934_v11 }
 0x44f   : > { %v2165_v16 = vadd.f32 %v2936_v15, %v4296_v9  ;;  %v2288_v17 = vmax.f32 %v2162_v13, 0.0 }
 0x451   : > { %v2289_v18 = vmax.f32 %v2165_v16, 0.0  ;;  %v2937_v19 = vpop.f32.mrb[68].mxu1 }
 0x452   : > { %v2938_v20 = vpop.f32.mrb[69].mxu1 }
 0x453   : > { %v2939_v21 = vadd.f32 %v2938_v20, %v2937_v19  ;;  %v2940_v22 = vpop.f32.mrb[70].mxu1  ;;  %v2320_v23 = vpack.c.bf16 %v2289_v18, %v2288_v17 }
 0x454   : > { %v2941_v24 = vpop.f32.mrb[71].mxu1 }
 0x455   : > { %v2170_v25 = vadd.f32 %v2939_v21, %v4296_v9  ;;  %v2942_v26 = vadd.f32 %v2941_v24, %v2940_v22  ;;  %3067 = vmatprep.mubr.bf16.mxu0 %v2320_v23 }
 0x457   : > { %v2173_v28 = vadd.f32 %v2942_v26, %v4296_v9  ;;  %v2290_v27 = vmax.f32 %v2170_v25, 0.0 }
 0x459   : > { %v2291_v29 = vmax.f32 %v2173_v28, 0.0  ;;  %v2943_v30 = vpop.f32.mrb[72].mxu1 }
 0x45a   : > { %v2944_v31 = vpop.f32.mrb[73].mxu1 }
 0x45b   : > { %v2321_v32 = vpack.c.bf16 %v2291_v29, %v2290_v27  ;;  %v2945_v33 = vadd.f32 %v2944_v31, %v2943_v30  ;;  %v2946_v34 = vpop.f32.mrb[74].mxu1 }
 0x45c   : > { %v2947_v35 = vpop.f32.mrb[75].mxu1 }
 0x45d   : > { %v2178_v36 = vadd.f32 %v2945_v33, %v4296_v9  ;;  %v2948_v8 = vadd.f32 %v2947_v35, %v2946_v34  ;;  %3068 = vmatmul.mubr.bf16.vlgmr.msra.gmra.mrb[128].mxu0 %v2321_v32 }
 0x45f   : > { %v2181_v10 = vadd.f32 %v2948_v8, %v4296_v9  ;;  %v2292_v37 = vmax.f32 %v2178_v36, 0.0 }
 0x461   : > { %v2293_v38 = vmax.f32 %v2181_v10, 0.0  ;;  %v2949_v39 = vpop.f32.mrb[76].mxu1 }
 0x462   : > { %v2950_v40 = vpop.f32.mrb[77].mxu1 }
 0x463   : > { %v2951_v41 = vadd.f32 %v2950_v40, %v2949_v39  ;;  %v2952_v42 = vpop.f32.mrb[78].mxu1  ;;  %v2322_v43 = vpack.c.bf16 %v2293_v38, %v2292_v37 }
 0x464   : > { %v2953_v44 = vpop.f32.mrb[79].mxu1 }
 0x465   : > { %v2186_v45 = vadd.f32 %v2951_v41, %v4296_v9  ;;  %v2954_v46 = vadd.f32 %v2953_v44, %v2952_v42  ;;  %3071 = vmatprep.mubr.bf16.mxu0 %v2322_v43 }
 0x467   : > { %v2189_v47 = vadd.f32 %v2954_v46, %v4296_v9  ;;  %v2294_v48 = vmax.f32 %v2186_v45, 0.0 }
 0x469   : > { %v2295_v49 = vmax.f32 %v2189_v47, 0.0  ;;  %v2955_v50 = vpop.f32.mrb[80].mxu1 }
 0x46a   : > { %v2956_v51 = vpop.f32.mrb[81].mxu1 }
 0x46b   : > { %v2957_v52 = vadd.f32 %v2956_v51, %v2955_v50  ;;  %v2958_v53 = vpop.f32.mrb[82].mxu1  ;;  %v2323_v54 = vpack.c.bf16 %v2295_v49, %v2294_v48 }
 0x46c   : > { %v2959_v55 = vpop.f32.mrb[83].mxu1 }
 0x46d   : > { %v2194_v56 = vadd.f32 %v2957_v52, %v4296_v9  ;;  %v2960_v57 = vadd.f32 %v2959_v55, %v2958_v53  ;;  %3072 = vmatmul.mubr.bf16.gmra.mrb[132].mxu0 %v2323_v54 }
 0x46f   : > { %v2197_v58 = vadd.f32 %v2960_v57, %v4296_v9  ;;  %v2296_v59 = vmax.f32 %v2194_v56, 0.0 }
 0x471   : > { %v2297_v60 = vmax.f32 %v2197_v58, 0.0  ;;  %v2961_v61 = vpop.f32.mrb[84].mxu1 }
 0x472   : > { %v2962_v62 = vpop.f32.mrb[85].mxu1 }
 0x473   : > { %v2963_v63 = vadd.f32 %v2962_v62, %v2961_v61  ;;  %v2964_v1 = vpop.f32.mrb[86].mxu1  ;;  %v2324_v2 = vpack.c.bf16 %v2297_v60, %v2296_v59 }
 0x474   : > { %v2965_v3 = vpop.f32.mrb[87].mxu1 }
 0x475   : > { %v2202_v4 = vadd.f32 %v2963_v63, %v4296_v9  ;;  %v2966_v5 = vadd.f32 %v2965_v3, %v2964_v1  ;;  %3075 = vmatprep.mubr.bf16.mxu0 %v2324_v2 }
 0x477   : > { %v2205_v6 = vadd.f32 %v2966_v5, %v4296_v9  ;;  %v2298_v7 = vmax.f32 %v2202_v4, 0.0 }
 0x479   : > { %v2299_v0 = vmax.f32 %v2205_v6, 0.0  ;;  %v2967_v12 = vpop.f32.mrb[88].mxu1 }
 0x47a   : > { %v2968_v11 = vpop.f32.mrb[89].mxu1 }
 0x47b   : > { %v2969_v14 = vadd.f32 %v2968_v11, %v2967_v12  ;;  %v2970_v13 = vpop.f32.mrb[90].mxu1  ;;  %v2325_v15 = vpack.c.bf16 %v2299_v0, %v2298_v7 }
 0x47c   : > { %v2971_v16 = vpop.f32.mrb[91].mxu1 }
 0x47d   : > { %v2210_v17 = vadd.f32 %v2969_v14, %v4296_v9  ;;  %v2972_v18 = vadd.f32 %v2971_v16, %v2970_v13  ;;  %3076 = vmatmul.mubr.bf16.gmra.mrb[136].mxu0 %v2325_v15 }
 0x47f   : > { %v2213_v19 = vadd.f32 %v2972_v18, %v4296_v9  ;;  %v2300_v20 = vmax.f32 %v2210_v17, 0.0 }
 0x481   : > { %v2301_v21 = vmax.f32 %v2213_v19, 0.0  ;;  %v2973_v22 = vpop.f32.mrb[92].mxu1 }
 0x482   : > { %v2974_v23 = vpop.f32.mrb[93].mxu1 }
 0x483   : > { %v2975_v24 = vadd.f32 %v2974_v23, %v2973_v22  ;;  %v2976_v25 = vpop.f32.mrb[94].mxu1  ;;  %v2326_v26 = vpack.c.bf16 %v2301_v21, %v2300_v20 }
 0x484   : > { %v2977_v28 = vpop.f32.mrb[95].mxu1 }
 0x485   : > { %v2218_v27 = vadd.f32 %v2975_v24, %v4296_v9  ;;  %v2978_v29 = vadd.f32 %v2977_v28, %v2976_v25  ;;  %3079 = vmatprep.mubr.bf16.mxu0 %v2326_v26 }
 0x487   : > { %v2221_v30 = vadd.f32 %v2978_v29, %v4296_v9  ;;  %v2302_v31 = vmax.f32 %v2218_v27, 0.0 }
 0x489   : > { %v2303_v32 = vmax.f32 %v2221_v30, 0.0  ;;  %v2979_v33 = vpop.f32.mrb[96].mxu1 }
 0x48a   : > { %v2980_v34 = vpop.f32.mrb[97].mxu1 }
 0x48b   : > { %v2981_v35 = vadd.f32 %v2980_v34, %v2979_v33  ;;  %v2982_v36 = vpop.f32.mrb[98].mxu1  ;;  %v2327_v8 = vpack.c.bf16 %v2303_v32, %v2302_v31 }
 0x48c   : > { %v2983_v10 = vpop.f32.mrb[99].mxu1 }
 0x48d   : > { %v2226_v37 = vadd.f32 %v2981_v35, %v4296_v9  ;;  %v2984_v38 = vadd.f32 %v2983_v10, %v2982_v36  ;;  %3080 = vmatmul.mubr.bf16.gmra.mrb[140].mxu0 %v2327_v8 }
 0x48f   : > { %v2229_v39 = vadd.f32 %v2984_v38, %v4296_v9  ;;  %v2304_v40 = vmax.f32 %v2226_v37, 0.0 }
 0x491   : > { %v2305_v41 = vmax.f32 %v2229_v39, 0.0  ;;  %v2985_v42 = vpop.f32.mrb[100].mxu1 }
 0x492   : > { %v2986_v43 = vpop.f32.mrb[101].mxu1 }
 0x493   : > { %v2987_v44 = vadd.f32 %v2986_v43, %v2985_v42  ;;  %v2988_v45 = vpop.f32.mrb[102].mxu1  ;;  %v2328_v46 = vpack.c.bf16 %v2305_v41, %v2304_v40 }
 0x494   : > { %v2989_v47 = vpop.f32.mrb[103].mxu1 }
 0x495   : > { %v2234_v48 = vadd.f32 %v2987_v44, %v4296_v9  ;;  %v2990_v49 = vadd.f32 %v2989_v47, %v2988_v45  ;;  %3083 = vmatprep.mubr.bf16.mxu0 %v2328_v46 }
 0x497   : > { %v2237_v50 = vadd.f32 %v2990_v49, %v4296_v9  ;;  %v2306_v51 = vmax.f32 %v2234_v48, 0.0 }
 0x499   : > { %v2307_v52 = vmax.f32 %v2237_v50, 0.0  ;;  %v2991_v53 = vpop.f32.mrb[104].mxu1 }
 0x49a   : > { %v2992_v54 = vpop.f32.mrb[105].mxu1 }
 0x49b   : > { %v2993_v55 = vadd.f32 %v2992_v54, %v2991_v53  ;;  %v2994_v56 = vpop.f32.mrb[106].mxu1  ;;  %v2329_v57 = vpack.c.bf16 %v2307_v52, %v2306_v51 }
 0x49c   : > { %v2995_v58 = vpop.f32.mrb[107].mxu1 }
 0x49d   : > { %v2242_v59 = vadd.f32 %v2993_v55, %v4296_v9  ;;  %v2996_v60 = vadd.f32 %v2995_v58, %v2994_v56  ;;  %3084 = vmatmul.mubr.bf16.gmra.mrb[144].mxu0 %v2329_v57  ;;  %v4333_v57 = vld [vmem:[%s4492_s29] ss:$0 sm:$0xff]  ;;  %s3619_s29 = scalar_lea.vmem %s3618_s26, 8192 }
 0x49e   : > { %p3621_p0 = scmp.lt.s32.totalorder %s3619_s29, %s3613_s11 }
 0x49f   : > { %v2245_v61 = vadd.f32 %v2996_v60, %v4296_v9  ;;  %v2308_v62 = vmax.f32 %v2242_v59, 0.0 }
 0x4a0   : > { %p3622_p2 = por %p3621_p0, %p3620_p13 }
 0x4a1   : > { %v2309_v63 = vmax.f32 %v2245_v61, 0.0  ;;  %v2997_v1 = vpop.f32.mrb[108].mxu1 }
 0x4a2   : > { %v2998_v2 = vpop.f32.mrb[109].mxu1  ;;  %p3623_p8 = pnand %p3622_p2, %p3616_p1 }
 0x4a3   : > { %v2999_v3 = vadd.f32 %v2998_v2, %v2997_v1  ;;  %v3000_v4 = vpop.f32.mrb[110].mxu1  ;;  %v2330_v5 = vpack.c.bf16 %v2309_v63, %v2308_v62 }
 0x4a4   : > { %v3001_v6 = vpop.f32.mrb[111].mxu1 }
 0x4a5   : > { %v2250_v7 = vadd.f32 %v2999_v3, %v4296_v9  ;;  %v3002_v0 = vadd.f32 %v3001_v6, %v3000_v4  ;;  %3087 = vmatprep.mubr.bf16.mxu0 %v2330_v5 }
 0x4a7   : > { %v2253_v12 = vadd.f32 %v3002_v0, %v4296_v9  ;;  %v2310_v11 = vmax.f32 %v2250_v7, 0.0 }
 0x4a9   : > { %v2311_v14 = vmax.f32 %v2253_v12, 0.0  ;;  %v3003_v13 = vpop.f32.mrb[112].mxu1 }
 0x4aa   : > { %v3004_v15 = vpop.f32.mrb[113].mxu1 }
 0x4ab   : > { %v3005_v16 = vadd.f32 %v3004_v15, %v3003_v13  ;;  %v3006_v17 = vpop.f32.mrb[114].mxu1  ;;  %v2331_v18 = vpack.c.bf16 %v2311_v14, %v2310_v11 }
 0x4ac   : > { %v3007_v19 = vpop.f32.mrb[115].mxu1 }
 0x4ad   : > { %v2258_v20 = vadd.f32 %v3005_v16, %v4296_v9  ;;  %v3008_v21 = vadd.f32 %v3007_v19, %v3006_v17  ;;  %3088 = vmatmul.mubr.bf16.gmra.mrb[148].mxu0 %v2331_v18 }
 0x4af   : > { %v2261_v22 = vadd.f32 %v3008_v21, %v4296_v9  ;;  %v2312_v23 = vmax.f32 %v2258_v20, 0.0 }
 0x4b1   : > { %v2313_v24 = vmax.f32 %v2261_v22, 0.0  ;;  %v3009_v25 = vpop.f32.mrb[116].mxu1 }
 0x4b2   : > { %v3010_v26 = vpop.f32.mrb[117].mxu1 }
 0x4b3   : > { %v3011_v28 = vadd.f32 %v3010_v26, %v3009_v25  ;;  %v3012_v27 = vpop.f32.mrb[118].mxu1  ;;  %v2332_v29 = vpack.c.bf16 %v2313_v24, %v2312_v23 }
 0x4b4   : > { %v3013_v30 = vpop.f32.mrb[119].mxu1 }
 0x4b5   : > { %v2266_v31 = vadd.f32 %v3011_v28, %v4296_v9  ;;  %v3014_v32 = vadd.f32 %v3013_v30, %v3012_v27  ;;  %3091 = vmatprep.mubr.bf16.mxu1 %v2332_v29 }
 0x4b7   : > { %v2269_v33 = vadd.f32 %v3014_v32, %v4296_v9  ;;  %v2314_v34 = vmax.f32 %v2266_v31, 0.0 }
 0x4b9   : > { %v2315_v35 = vmax.f32 %v2269_v33, 0.0  ;;  %v3015_v36 = vpop.f32.mrb[120].mxu1 }
 0x4ba   : > { %v3016_v8 = vpop.f32.mrb[121].mxu1 }
 0x4bb   : > { %v2333_v10 = vpack.c.bf16 %v2315_v35, %v2314_v34  ;;  %v3017_v37 = vadd.f32 %v3016_v8, %v3015_v36  ;;  %v3018_v38 = vpop.f32.mrb[122].mxu1 }
 0x4bc   : > { %v3019_v39 = vpop.f32.mrb[123].mxu1 }
 0x4bd   : > { %v2274_v40 = vadd.f32 %v3017_v37, %v4296_v9  ;;  %v3020_v41 = vadd.f32 %v3019_v39, %v3018_v38  ;;  %3092 = vmatmul.mubr.bf16.vlgmr.msra.gmra.mrb[128].mxu1 %v2333_v10 }
 0x4bf   : > { %v2277_v42 = vadd.f32 %v3020_v41, %v4296_v9  ;;  %v2316_v43 = vmax.f32 %v2274_v40, 0.0 }
 0x4c1   : > { %v2317_v44 = vmax.f32 %v2277_v42, 0.0  ;;  %v3021_v45 = vpop.f32.mrb[124].mxu1 }
 0x4c2   : > { %v3022_v46 = vpop.f32.mrb[125].mxu1 }
 0x4c3   : > { %v3023_v47 = vadd.f32 %v3022_v46, %v3021_v45  ;;  %v3024_v48 = vpop.f32.mrb[126].mxu1  ;;  %v2334_v49 = vpack.c.bf16 %v2317_v44, %v2316_v43 }
 0x4c4   : > { %v3025_v50 = vpop.f32.mrb[127].mxu1 }
 0x4c5   : > { %v2282_v51 = vadd.f32 %v3023_v47, %v4296_v9  ;;  %v3026_v52 = vadd.f32 %v3025_v50, %v3024_v48  ;;  %3095 = vmatprep.mubr.bf16.mxu1 %v2334_v49 }
 0x4c7   : > { %v2285_v53 = vadd.f32 %v3026_v52, %v4296_v9  ;;  %v2318_v54 = vmax.f32 %v2282_v51, 0.0 }
 0x4c9   : > { %v2319_v55 = vmax.f32 %v2285_v53, 0.0 }
 0x4cb   : > { %v2335_v56 = vpack.c.bf16 %v2319_v55, %v2318_v54 }
 0x4cd   : > { %3096 = vmatmul.mubr.bf16.gmra.mrb[132].mxu1 %v2335_v56 }
 0x530   : > { %v3069_v58 = vpop.f32.mrb[128].mxu0 }
 0x531   : > { %v2450_v59 = vadd.f32 %v3069_v58, %v4333_v57  ;;  %v2441_v60 = vpop.f32.mrb[129].mxu0 }
 0x532   : > { %v2442_v61 = vadd.f32 %v4333_v57, %v2441_v60  ;;  %v3070_v62 = vpop.f32.mrb[130].mxu0 }
 0x533   : > { %3379 = vtanh.f32 %v2450_v59  ;;  %v2453_v9 = vadd.f32 %v3070_v62, %v4333_v57  ;;  %v2444_v63 = vpop.f32.mrb[131].mxu0 }
 0x534   : > { %3381 = vtanh.f32 %v2442_v61  ;;  %v2445_v1 = vadd.f32 %v4333_v57, %v2444_v63 }
 0x535   : > { %3383 = vtanh.f32 %v2453_v9 }
 0x536   : > { %3385 = vtanh.f32 %v2445_v1 }
 0x53d   : > { %v3380_v2 = vpop.eup %3379 }
 0x53e   : > { %v3382_v3 = vpop.eup %3381  ;;  %2602 = vst [vmem:[%s4340_s30 + $0x10] sm:$0xff] %v3380_v2 }
 0x53f   : > { %v3384_v4 = vpop.eup %3383  ;;  %2600 = vst [vmem:[%s4340_s30] sm:$0xff] %v3382_v3 }
 0x540   : > { %v3386_v5 = vpop.eup %3385  ;;  %2603 = vst [vmem:[%s4340_s30 + $0x18] sm:$0xff] %v3384_v4  ;;  %v3073_v6 = vpop.f32.mrb[132].mxu0 }
 0x541   : > { %2601 = vst [vmem:[%s4340_s30 + $0x8] sm:$0xff] %v3386_v5  ;;  %v2466_v7 = vadd.f32 %v3073_v6, %v4333_v57  ;;  %v2457_v0 = vpop.f32.mrb[133].mxu0 }
 0x542   : > { %v2458_v12 = vadd.f32 %v4333_v57, %v2457_v0  ;;  %v3074_v11 = vpop.f32.mrb[134].mxu0 }
 0x543   : > { %3387 = vtanh.f32 %v2466_v7  ;;  %v2469_v14 = vadd.f32 %v3074_v11, %v4333_v57  ;;  %v2460_v13 = vpop.f32.mrb[135].mxu0 }
 0x544   : > { %3389 = vtanh.f32 %v2458_v12  ;;  %v2461_v15 = vadd.f32 %v4333_v57, %v2460_v13 }
 0x545   : > { %3391 = vtanh.f32 %v2469_v14 }
 0x546   : > { %3393 = vtanh.f32 %v2461_v15 }
 0x54d   : > { %v3388_v16 = vpop.eup %3387 }
 0x54e   : > { %v3390_v17 = vpop.eup %3389  ;;  %2606 = vst [vmem:[%s4340_s30 + $0x30] sm:$0xff] %v3388_v16 }
 0x54f   : > { %v3392_v18 = vpop.eup %3391  ;;  %2604 = vst [vmem:[%s4340_s30 + $0x20] sm:$0xff] %v3390_v17 }
 0x550   : > { %v3394_v19 = vpop.eup %3393  ;;  %2607 = vst [vmem:[%s4340_s30 + $0x38] sm:$0xff] %v3392_v18  ;;  %v3077_v20 = vpop.f32.mrb[136].mxu0 }
 0x551   : > { %2605 = vst [vmem:[%s4340_s30 + $0x28] sm:$0xff] %v3394_v19  ;;  %v2482_v21 = vadd.f32 %v3077_v20, %v4333_v57  ;;  %v2473_v22 = vpop.f32.mrb[137].mxu0 }
 0x552   : > { %v2474_v23 = vadd.f32 %v4333_v57, %v2473_v22  ;;  %v3078_v24 = vpop.f32.mrb[138].mxu0 }
 0x553   : > { %3395 = vtanh.f32 %v2482_v21  ;;  %v2485_v25 = vadd.f32 %v3078_v24, %v4333_v57  ;;  %v2476_v26 = vpop.f32.mrb[139].mxu0 }
 0x554   : > { %3397 = vtanh.f32 %v2474_v23  ;;  %v2477_v28 = vadd.f32 %v4333_v57, %v2476_v26 }
 0x555   : > { %3399 = vtanh.f32 %v2485_v25 }
 0x556   : > { %3401 = vtanh.f32 %v2477_v28 }
 0x55d   : > { %v3396_v27 = vpop.eup %3395 }
 0x55e   : > { %v3398_v29 = vpop.eup %3397  ;;  %2610 = vst [vmem:[%s4340_s30 + $0x50] sm:$0xff] %v3396_v27 }
 0x55f   : > { %v3400_v30 = vpop.eup %3399  ;;  %2608 = vst [vmem:[%s4340_s30 + $0x40] sm:$0xff] %v3398_v29 }
 0x560   : > { %v3402_v31 = vpop.eup %3401  ;;  %2611 = vst [vmem:[%s4340_s30 + $0x58] sm:$0xff] %v3400_v30  ;;  %v3081_v32 = vpop.f32.mrb[140].mxu0 }
 0x561   : > { %2609 = vst [vmem:[%s4340_s30 + $0x48] sm:$0xff] %v3402_v31  ;;  %v2498_v33 = vadd.f32 %v3081_v32, %v4333_v57  ;;  %v2489_v34 = vpop.f32.mrb[141].mxu0 }
 0x562   : > { %v2490_v35 = vadd.f32 %v4333_v57, %v2489_v34  ;;  %v3082_v36 = vpop.f32.mrb[142].mxu0 }
 0x563   : > { %3403 = vtanh.f32 %v2498_v33  ;;  %v2501_v8 = vadd.f32 %v3082_v36, %v4333_v57  ;;  %v2492_v10 = vpop.f32.mrb[143].mxu0 }
 0x564   : > { %3405 = vtanh.f32 %v2490_v35  ;;  %v2493_v37 = vadd.f32 %v4333_v57, %v2492_v10 }
 0x565   : > { %3407 = vtanh.f32 %v2501_v8 }
 0x566   : > { %3409 = vtanh.f32 %v2493_v37 }
 0x56d   : > { %v3404_v38 = vpop.eup %3403 }
 0x56e   : > { %v3406_v39 = vpop.eup %3405  ;;  %2614 = vst [vmem:[%s4340_s30 + $0x70] sm:$0xff] %v3404_v38 }
 0x56f   : > { %v3408_v40 = vpop.eup %3407  ;;  %2612 = vst [vmem:[%s4340_s30 + $0x60] sm:$0xff] %v3406_v39 }
 0x570   : > { %v3410_v41 = vpop.eup %3409  ;;  %2615 = vst [vmem:[%s4340_s30 + $0x78] sm:$0xff] %v3408_v40  ;;  %v3085_v42 = vpop.f32.mrb[144].mxu0 }
 0x571   : > { %2613 = vst [vmem:[%s4340_s30 + $0x68] sm:$0xff] %v3410_v41  ;;  %v2514_v43 = vadd.f32 %v3085_v42, %v4333_v57  ;;  %v2505_v44 = vpop.f32.mrb[145].mxu0 }
 0x572   : > { %v2506_v45 = vadd.f32 %v4333_v57, %v2505_v44  ;;  %v3086_v46 = vpop.f32.mrb[146].mxu0 }
 0x573   : > { %3411 = vtanh.f32 %v2514_v43  ;;  %v2517_v47 = vadd.f32 %v3086_v46, %v4333_v57  ;;  %v2508_v48 = vpop.f32.mrb[147].mxu0 }
 0x574   : > { %3413 = vtanh.f32 %v2506_v45  ;;  %v2509_v49 = vadd.f32 %v4333_v57, %v2508_v48 }
 0x575   : > { %3415 = vtanh.f32 %v2517_v47 }
 0x576   : > { %3417 = vtanh.f32 %v2509_v49 }
 0x57d   : > { %v3412_v50 = vpop.eup %3411 }
 0x57e   : > { %v3414_v51 = vpop.eup %3413  ;;  %2618 = vst [vmem:[%s4340_s30 + $0x90] sm:$0xff] %v3412_v50 }
 0x57f   : > { %v3416_v52 = vpop.eup %3415  ;;  %2616 = vst [vmem:[%s4340_s30 + $0x80] sm:$0xff] %v3414_v51 }
 0x580   : > { %v3418_v53 = vpop.eup %3417  ;;  %2619 = vst [vmem:[%s4340_s30 + $0x98] sm:$0xff] %v3416_v52  ;;  %v3089_v54 = vpop.f32.mrb[148].mxu0 }
 0x581   : > { %2617 = vst [vmem:[%s4340_s30 + $0x88] sm:$0xff] %v3418_v53  ;;  %v2530_v55 = vadd.f32 %v3089_v54, %v4333_v57  ;;  %v2521_v56 = vpop.f32.mrb[149].mxu0 }
 0x582   : > { %v2522_v58 = vadd.f32 %v4333_v57, %v2521_v56  ;;  %v3090_v59 = vpop.f32.mrb[150].mxu0 }
 0x583   : > { %3419 = vtanh.f32 %v2530_v55  ;;  %v2533_v60 = vadd.f32 %v3090_v59, %v4333_v57  ;;  %v2524_v61 = vpop.f32.mrb[151].mxu0 }
 0x584   : > { %3421 = vtanh.f32 %v2522_v58  ;;  %v2525_v62 = vadd.f32 %v4333_v57, %v2524_v61 }
 0x585   : > { %3423 = vtanh.f32 %v2533_v60 }
 0x586   : > { %3425 = vtanh.f32 %v2525_v62 }
 0x58d   : > { %v3420_v9 = vpop.eup %3419 }
 0x58e   : > { %v3422_v63 = vpop.eup %3421  ;;  %2622 = vst [vmem:[%s4340_s30 + $0xb0] sm:$0xff] %v3420_v9 }
 0x58f   : > { %v3424_v1 = vpop.eup %3423  ;;  %2620 = vst [vmem:[%s4340_s30 + $0xa0] sm:$0xff] %v3422_v63 }
 0x590   : > { %v3426_v2 = vpop.eup %3425  ;;  %2623 = vst [vmem:[%s4340_s30 + $0xb8] sm:$0xff] %v3424_v1  ;;  %v3093_v3 = vpop.f32.mrb[128].mxu1 }
 0x591   : > { %2621 = vst [vmem:[%s4340_s30 + $0xa8] sm:$0xff] %v3426_v2  ;;  %v2546_v4 = vadd.f32 %v3093_v3, %v4333_v57  ;;  %v2537_v5 = vpop.f32.mrb[129].mxu1 }
 0x592   : > { %v2538_v6 = vadd.f32 %v4333_v57, %v2537_v5  ;;  %v3094_v7 = vpop.f32.mrb[130].mxu1 }
 0x593   : > { %3427 = vtanh.f32 %v2546_v4  ;;  %v2549_v0 = vadd.f32 %v3094_v7, %v4333_v57  ;;  %v2540_v12 = vpop.f32.mrb[131].mxu1 }
 0x594   : > { %3429 = vtanh.f32 %v2538_v6  ;;  %v2541_v11 = vadd.f32 %v4333_v57, %v2540_v12 }
 0x595   : > { %3431 = vtanh.f32 %v2549_v0 }
 0x596   : > { %3433 = vtanh.f32 %v2541_v11 }
 0x59d   : > { %v3428_v14 = vpop.eup %3427 }
 0x59e   : > { %v3430_v13 = vpop.eup %3429  ;;  %2626 = vst [vmem:[%s4340_s30 + $0xd0] sm:$0xff] %v3428_v14 }
 0x59f   : > { %v3432_v15 = vpop.eup %3431  ;;  %2624 = vst [vmem:[%s4340_s30 + $0xc0] sm:$0xff] %v3430_v13 }
 0x5a0   : > { %v3434_v16 = vpop.eup %3433  ;;  %2627 = vst [vmem:[%s4340_s30 + $0xd8] sm:$0xff] %v3432_v15  ;;  %v3097_v17 = vpop.f32.mrb[132].mxu1 }
 0x5a1   : > { %2625 = vst [vmem:[%s4340_s30 + $0xc8] sm:$0xff] %v3434_v16  ;;  %v2562_v18 = vadd.f32 %v3097_v17, %v4333_v57  ;;  %v2553_v19 = vpop.f32.mrb[133].mxu1 }
 0x5a2   : > { %v2554_v20 = vadd.f32 %v4333_v57, %v2553_v19  ;;  %v3098_v21 = vpop.f32.mrb[134].mxu1 }
 0x5a3   : > { %3435 = vtanh.f32 %v2562_v18  ;;  %v2565_v22 = vadd.f32 %v3098_v21, %v4333_v57  ;;  %v2556_v23 = vpop.f32.mrb[135].mxu1 }
 0x5a4   : > { %3437 = vtanh.f32 %v2554_v20  ;;  %v2557_v24 = vadd.f32 %v4333_v57, %v2556_v23 }
 0x5a5   : > { %3439 = vtanh.f32 %v2565_v22 }
 0x5a6   : > { %3441 = vtanh.f32 %v2557_v24 }
 0x5ad   : > { %v3436_v25 = vpop.eup %3435 }
 0x5ae   : > { %v3438_v26 = vpop.eup %3437  ;;  %2630 = vst [vmem:[%s4340_s30 + $0xf0] sm:$0xff] %v3436_v25 }
 0x5af   : > { %v3440_v28 = vpop.eup %3439  ;;  %2628 = vst [vmem:[%s4340_s30 + $0xe0] sm:$0xff] %v3438_v26 }
 0x5b0   : > { %v3442_v57 = vpop.eup %3441  ;;  %2631 = vst [vmem:[%s4340_s30 + $0xf8] sm:$0xff] %v3440_v28 }
 0x5b1   : > { %2629 = vst [vmem:[%s4340_s30 + $0xe8] sm:$0xff] %v3442_v57 }
 0x5b2   : > { %3626 = shalt.err (!%p3623_p8)
}
 0x5b3   : > { %s3627_s24 = scalar_lea.hbm %s4404_s12, 4096  ;;  %s3631_s14 = scalar_lea.hbm %s4493_s22, 8192 }
 0x5b4   : > { %p3628_p6 = scmp.ne.s32.totalorder %s4404_s12, %s3627_s24  ;;  %p3632_p3 = scmp.lt.u32.totalorder %s4404_s12, %s4493_s22 }
 0x5b5   : > { %p3633_p5 = scmp.lt.u32.totalorder %s3631_s14, %s3627_s24  ;;  %p3635_p7 = scmp.lt.u32.totalorder %s3627_s24, %s4404_s12 }
 0x5b6   : > { %p3629_p10 = pnand %p3628_p6, %p4494_p4 }
 0x5b7   : > { %p3634_p9 = por %p3633_p5, %p3632_p3 }
 0x5b8   : > { %p3630_p11 = pneg %p3629_p10 }
 0x5b9   : > { %p3636_p12 = por %p3635_p7, %p3634_p9 }
 0x5bb   : > { %p3637_p1 = pnand %p3636_p12, %p3630_p11 }
 0x5bd   : > { %3640 = shalt.err (!%p3637_p1)
}
 0x5be   : > { %s3705_s11 = smov 128   ;;  %s3706_s26 = smov 8  }
 0x5bf   : > { %3137 = dma.vmem_to_hbm [thread:$0]  (%p4494_p4), %s4406_s8, 4096, %s4404_s12, %s2633_s23, %s3705_s11, %s3705_s11, %s3706_s26  }
 0x5c0 PF: > { %s2661_s29 = sand.u32 1, %s3679_s17   ;;  %p4495_p13 = scmp.ne.s32.totalorder %s4480_s28, 0 }
 0x5c1   : > { %p4496_p0 = scmp.ge.s32.totalorder %s3691_s20, 2  ;;  %s2662_s24 = scalar_lea.sflag [#allocation4], %s2661_s29 }
 0x5c3   : > { %p3160_p2 = pnand %p4496_p0, %p4495_p13 }
 0x5c5   : > { %3674 = dma.done.wait (!%p3160_p2), %s2662_s24, 4096  }
 0x5c6   : > { %3676 = vsyncadd (!%p3160_p2), %s2662_s24, 4294963200  ;;  %p27_p8 = scmp.ge.s32.totalorder %s3940_s16, 4   ;;  %s4497_s17 = smov %s3683_s18 }
 0x5c7   : > { %s4498_s18 = smov %s3687_s19  ;;  %s4499_s19 = smov %s3952_s15 }
 0x5c8   : > { %s4500_s20 = smov %s3940_s16  ;;  %29 = sbr.rel (!%p27_p8) target bundleno = 12 (0xc), region = 129 }
 0x5cf   :  { %2667 = vsyncpa [#allocation3], 1 }
 0x5d0   :  { %2669 = vsyncpa [#allocation3 + $0x1], 1 }
 0x5d1   :  { %2670 = vsyncpa [#allocation6], 1 }
 0x5d2   :  { %2671 = vsyncpa [#allocation9], 1 }
 0x5d3   :  { %2672 = vsyncpa [#allocation12], 1 }
 0x5d4   :  { %2673 = vsyncpa [#allocation4], 1 }
 0x5d5   :  { %2675 = vsyncpa [#allocation4 + $0x1], 1 }

</bundles_post_ra>
